<compile_context>
chip_gen: v5e
topology: v5e:2x2
jax: 0.10.0
libtpu: 0.0.40
codegen_flags: <defaults>
</compile_context>

<pallas_src>
import functools

import jax
import jax.numpy as jnp
from jax.experimental import pallas as pl
from jax.experimental.pallas import tpu as pltpu

EPS = 1e-5
CP = 128  # padded channel width (one vreg lane block)


def _bn(y, gamma, beta):
    # Training-mode BatchNorm1d with single-pass statistics.
    # Padded lanes stay exactly zero because gamma == beta == 0 there.
    mean = jnp.mean(y, axis=0, keepdims=True)
    mean_sq = jnp.mean(y * y, axis=0, keepdims=True)
    var = jnp.maximum(mean_sq - mean * mean, 0.0)
    return (y - mean) * jax.lax.rsqrt(var + EPS) * gamma + beta


def _conv_k3(x, xb, w0, w1, w2, nf, nl):
    """k=3, padding=1 conv over the (rows = batch*position, lanes = channels) slab.

    x : (NL, C) f32 activations; xb: same values pre-cast to bf16 (center tap).
    w*: (C, CP) bf16 weight taps (w0 -> x[l-1], w1 -> x[l], w2 -> x[l+1]).
    nf/nl: (NL, C) f32 {0,1} masks, zero on per-sequence first / last rows, so
    rows rolled in from neighbouring sequences (or the wraparound) never leak.
    Rolls are done on the f32 slab (32-bit sublane rotate); taps are cast at the
    dot -- no im2col concat is materialized, the MXU accumulates in f32.
    """
    nl_rows = x.shape[0]
    x_prev = pltpu.roll(x, 1, axis=0) * nf              # row l <- x[l-1]
    x_next = pltpu.roll(x, nl_rows - 1, axis=0) * nl    # row l <- x[l+1]
    acc = jnp.dot(x_prev.astype(jnp.bfloat16), w0, preferred_element_type=jnp.float32)
    acc = acc + jnp.dot(xb, w1, preferred_element_type=jnp.float32)
    acc = acc + jnp.dot(x_next.astype(jnp.bfloat16), w2, preferred_element_type=jnp.float32)
    return acc


def multires_kernel(x_ref, w_in_ref, w_deep_ref, bn_ref, o_ref, *, L):
    xf = x_ref[...]                                  # (NL, Cin) f32
    NL, Cin = xf.shape
    bnp = bn_ref[...]                                # (12, CP) f32; see prepare_params

    # Boundary masks, pre-broadcast once per needed width and reused by every conv.
    row_in = jax.lax.broadcasted_iota(jnp.int32, (NL, Cin), 0) % L
    nf_in = (row_in != 0).astype(jnp.float32)
    nl_in = (row_in != L - 1).astype(jnp.float32)
    row = jax.lax.broadcasted_iota(jnp.int32, (NL, CP), 0) % L
    nf = (row != 0).astype(jnp.float32)
    nl = (row != L - 1).astype(jnp.float32)

    xb = xf.astype(jnp.bfloat16)                     # cast once; conv3 + shortcut reuse it

    # shortcut = ConvBNReLU(Cin, csc, 1, padding=0, activation=False).
    # Conv bias dropped: cancelled by the training-mode BN mean subtraction.
    sc = _bn(jnp.dot(xb, w_in_ref[3], preferred_element_type=jnp.float32),
             bnp[6:7], bnp[7:8])

    # conv3x3 -> conv5x5 -> conv7x7; each branch lands in its own disjoint lane slot.
    c3 = jnp.maximum(
        _bn(_conv_k3(xf, xb, w_in_ref[0], w_in_ref[1], w_in_ref[2], nf_in, nl_in),
            bnp[0:1], bnp[1:2]), 0.0)
    c5 = jnp.maximum(
        _bn(_conv_k3(c3, c3.astype(jnp.bfloat16),
                     w_deep_ref[0], w_deep_ref[1], w_deep_ref[2], nf, nl),
            bnp[2:3], bnp[3:4]), 0.0)
    c7 = jnp.maximum(
        _bn(_conv_k3(c5, c5.astype(jnp.bfloat16),
                     w_deep_ref[3], w_deep_ref[4], w_deep_ref[5], nf, nl),
            bnp[4:5], bnp[5:6]), 0.0)

    # torch.cat(dim=1): the branch slots occupy disjoint lanes (zero elsewhere),
    # so concatenation is a plain add.  NOTE: relies on zero-padded gamma/beta/weights.
    cat = c3 + c5 + c7
    out = jnp.maximum(_bn(cat, bnp[8:9], bnp[9:10]) + sc, 0.0)
    o_ref[...] = _bn(out, bnp[10:11], bnp[11:12])


def prepare_params(p, cin, c3, c5, c7):
    """Pack native params into the kernel's fused layout.

    Lane slots (torch.cat offsets): conv3 -> [0,c3), conv5 -> [c3,c3+c5),
    conv7 -> [c3+c5,csc); shortcut / bn1 / bn2 cover [0,csc).  Everything
    outside its slot is zero.  Conv biases are intentionally dropped: a
    per-channel constant added before a training-mode BatchNorm is exactly
    cancelled by the mean subtraction.
    """
    o3, o5, o7 = 0, c3, c3 + c5
    csc = c3 + c5 + c7
    assert csc <= CP, (csc, CP)

    def conv_w(w, in_off, in_width, out_off):
        k, cin_w, cout = w.shape
        wp = jnp.zeros((k, in_width, CP), jnp.float32)
        wp = wp.at[:, in_off:in_off + cin_w, out_off:out_off + cout].set(w)
        return wp.astype(jnp.bfloat16)

    w3 = conv_w(p["w3"], 0, cin, o3)                 # (3, cin, CP)
    ws = conv_w(p["ws"][None, :, :], 0, cin, 0)      # (1, cin, CP)
    w5 = conv_w(p["w5"], o3, CP, o5)                 # (3, CP, CP)
    w7 = conv_w(p["w7"], o5, CP, o7)                 # (3, CP, CP)

    def bn_rows(bn, off):
        out = jnp.zeros((2, CP), jnp.float32)
        return out.at[:, off:off + bn.shape[1]].set(bn)

    # Row layout of the packed BN table: bn3[0:2], bn5[2:4], bn7[4:6],
    # bns[6:8], bn1[8:10], bn2[10:12]  (row 0 = gamma, row 1 = beta per pair).
    bn_pack = jnp.concatenate(
        [bn_rows(p["bn3"], o3), bn_rows(p["bn5"], o5), bn_rows(p["bn7"], o7),
         bn_rows(p["bns"], 0), bn_rows(p["bn1"], 0), bn_rows(p["bn2"], 0)],
        axis=0)

    return dict(w_in=jnp.concatenate([w3, ws], axis=0),    # (4, cin, CP) bf16
                w_deep=jnp.concatenate([w5, w7], axis=0),  # (6, CP, CP)  bf16
                bn=bn_pack)                                # (12, CP)     f32


def multires_block(x_ncl, kp, csc):
    """x_ncl: (N, Cin, L) float32 -> (N, csc, L) float32 (PyTorch NCL convention)."""
    N, Cin, L = x_ncl.shape
    NL = N * L
    assert NL % 8 == 0, "row count must be sublane-aligned for the token slab"
    # Monolithic-kernel VMEM sanity check (~12 live (NL,128) f32 slabs).
    est_bytes = 12 * NL * CP * 4
    assert est_bytes < 40 * 1024 * 1024, (
        f"monolithic MultiResBlock kernel would exceed its VMEM budget at NL={NL}; "
        "use the row-tiled two-pass-BN variant (see TODO)")

    xf = jnp.transpose(x_ncl, (0, 2, 1)).reshape(NL, Cin)
    kern = functools.partial(multires_kernel, L=L)
    out_pad = pl.pallas_call(
        kern,
        out_shape=jax.ShapeDtypeStruct((NL, CP), jnp.float32),
        in_specs=[pl.BlockSpec(memory_space=pltpu.MemorySpace.VMEM)] * 4,
        out_specs=pl.BlockSpec(memory_space=pltpu.MemorySpace.VMEM),
        compiler_params=pltpu.CompilerParams(vmem_limit_bytes=48 * 1024 * 1024),
    )(xf, kp["w_in"], kp["w_deep"], kp["bn"])
    out = out_pad[:, :csc]
    return jnp.transpose(out.reshape(N, L, csc), (0, 2, 1))


def multires_reference(x_ncl, p, *, bf16_dot, with_bias):
    """Pure-JAX mirror of the PyTorch MultiResBlock forward (training-mode BN).

    Independent of the kernel's tricks: native channel widths, per-sequence
    padding via jnp.pad, real concatenation.  bf16_dot=False, with_bias=True is
    exactly the PyTorch module's math in f32.
    """
    N, Cin, L = x_ncl.shape
    h = jnp.transpose(x_ncl, (0, 2, 1))              # (N, L, Cin)

    def dot(a, w):
        if bf16_dot:
            a, w = a.astype(jnp.bfloat16), w.astype(jnp.bfloat16)
        return jnp.dot(a, w, preferred_element_type=jnp.float32)

    def conv3(x, w, b):                              # k=3, padding=1
        xp = jnp.pad(x, ((0, 0), (1, 1), (0, 0)))
        flat = lambda t: t.reshape(N * L, t.shape[-1])
        y = (dot(flat(xp[:, :-2]), w[0]) + dot(flat(xp[:, 1:-1]), w[1])
             + dot(flat(xp[:, 2:]), w[2]))
        return y + b[None, :] if with_bias else y

    def conv1(x, w, b):
        y = dot(x.reshape(N * L, -1), w)
        return y + b[None, :] if with_bias else y

    def bn(y, gb):
        mean = jnp.mean(y, axis=0, keepdims=True)
        var = jnp.mean(jnp.square(y - mean), axis=0, keepdims=True)
        return (y - mean) * jax.lax.rsqrt(var + EPS) * gb[0:1, :] + gb[1:2, :]

    relu = lambda t: jnp.maximum(t, 0.0)

    sc = bn(conv1(h, p["ws"], p["bs"]), p["bns"])
    c3 = relu(bn(conv3(h, p["w3"], p["b3"]), p["bn3"]))
    c5 = relu(bn(conv3(c3.reshape(N, L, -1), p["w5"], p["b5"]), p["bn5"]))
    c7 = relu(bn(conv3(c5.reshape(N, L, -1), p["w7"], p["b7"]), p["bn7"]))
    cat = jnp.concatenate([c3, c5, c7], axis=-1)     # (N*L, csc)
    out = bn(relu(bn(cat, p["bn1"]) + sc), p["bn2"])
    return jnp.transpose(out.reshape(N, L, -1), (0, 2, 1))


def init_params(key, U, in_channels, alpha=2.5):
    W = alpha * U
    c3 = int(W * 0.167)
    c5 = int(W * 0.333)
    c7 = int(W * 0.5)
    csc = c3 + c5 + c7
    keys = jax.random.split(key, 14)

    def conv_w(k, cin, cout):
        # (tap, in, out); tap t maps to torch Conv1d weight[out, in, t]
        return 0.2 * jax.random.normal(k, (3, cin, cout), jnp.float32)

    def bias(k, c):
        return 0.1 * jax.random.normal(k, (c,), jnp.float32)

    def bn(k, c):
        g = 1.0 + 0.1 * jax.random.normal(k, (1, c), jnp.float32)
        b = 0.1 * jax.random.normal(jax.random.fold_in(k, 1), (1, c), jnp.float32)
        return jnp.concatenate([g, b], axis=0)       # (2, C): row0=gamma, row1=beta

    params = {
        "w3": conv_w(keys[0], in_channels, c3), "b3": bias(keys[1], c3),
        "bn3": bn(keys[2], c3),
        "w5": conv_w(keys[3], c3, c5), "b5": bias(keys[4], c5),
        "bn5": bn(keys[5], c5),
        "w7": conv_w(keys[6], c5, c7), "b7": bias(keys[7], c7),
        "bn7": bn(keys[8], c7),
        "ws": 0.2 * jax.random.normal(keys[9], (in_channels, csc), jnp.float32),
        "bs": bias(keys[10], csc), "bns": bn(keys[11], csc),
        "bn1": bn(keys[12], csc), "bn2": bn(keys[13], csc),
    }
    return params, (c3, c5, c7, csc)


if __name__ == "__main__":
    U, in_channels = 12, 4      # W = 30 -> branch channels (5, 9, 15), shortcut 29
    N, L = 2, 16

    key = jax.random.PRNGKey(0)
    k_param, k_x = jax.random.split(key)
    params, (c3, c5, c7, csc) = init_params(k_param, U, in_channels)
    kparams = prepare_params(params, in_channels, c3, c5, c7)

    x = jax.random.normal(k_x, (N, in_channels, L), jnp.float32)  # NCL like torch

    out = jax.block_until_ready(multires_block(x, kparams, csc))
    assert out.shape == (N, csc, L), out.shape
    assert bool(jnp.all(jnp.isfinite(out)))

    # Check 1 (lowering): same-math reference (bf16 dots, biases dropped) built
    # with plain jnp.pad/slices -> validates roll direction, lane-slot packing
    # and the fused single-pass BN against an independent formulation.
    ref_same = multires_reference(x, params, bf16_dot=True, with_bias=False)
    err_lowering = float(jnp.max(jnp.abs(out - ref_same)))
    assert err_lowering < 1e-2, err_lowering

    # Check 2 (numerics): full-precision reference (f32 dots, conv biases kept,
    # exactly the PyTorch module's math) -> bounds the bf16-MXU error and
    # verifies that dropping the biases under training-mode BN is exact.
    ref_f32 = multires_reference(x, params, bf16_dot=False, with_bias=True)
    err_f32 = float(jnp.max(jnp.abs(out - ref_f32)))
    assert err_f32 < 0.25, err_f32

    print("KERNEL_OK")
</pallas_src>

<mosaic_0001>
module attributes {stable_mosaic.version = 11 : i64} {
  func.func @multires_kernel(%arg0: memref<32x4xf32, #tpu.memory_space<vmem>>, %arg1: memref<4x4x128xbf16, #tpu.memory_space<vmem>>, %arg2: memref<6x128x128xbf16, #tpu.memory_space<vmem>>, %arg3: memref<12x128xf32, #tpu.memory_space<vmem>>, %arg4: memref<32x128xf32, #tpu.memory_space<vmem>>) attributes {dimension_semantics = [], scalar_prefetch = 0 : i64, scratch_operands = 0 : i64, tpu.core_type = #tpu.core_type<tc>} {
    %c0 = arith.constant 0 : index
    %c0_0 = arith.constant 0 : index
    %0 = vector.load %arg0[%c0, %c0_0] : memref<32x4xf32, #tpu.memory_space<vmem>>, vector<32x4xf32>
    %c0_1 = arith.constant 0 : index
    %c0_2 = arith.constant 0 : index
    %1 = vector.load %arg3[%c0_1, %c0_2] : memref<12x128xf32, #tpu.memory_space<vmem>>, vector<12x128xf32>
    %2 = tpu.iota {dimensions = array<i32: 0>} : vector<32x4xi32>
    %c16_i32 = arith.constant 16 : i32
    %c0_i32 = arith.constant 0 : i32
    %3 = arith.cmpi eq, %c16_i32, %c0_i32 : i32
    %c1_i32 = arith.constant 1 : i32
    %4 = arith.select %3, %c1_i32, %c16_i32 : i32
    %5 = vector.broadcast %4 : i32 to vector<32x4xi32>
    %6 = arith.remsi %2, %5 : vector<32x4xi32>
    %c0_i32_3 = arith.constant 0 : i32
    %7 = vector.broadcast %c0_i32_3 : i32 to vector<32x4xi32>
    %8 = arith.cmpi ne, %6, %7 : vector<32x4xi32>
    %c0_i32_4 = arith.constant 0 : i32
    %9 = vector.broadcast %c0_i32_4 : i32 to vector<32x4xi32>
    %10 = arith.cmpi slt, %6, %9 : vector<32x4xi32>
    %c0_i32_5 = arith.constant 0 : i32
    %11 = arith.cmpi slt, %4, %c0_i32_5 : i32
    %12 = vector.broadcast %11 : i1 to vector<32x4xi1>
    %13 = vector.broadcast %12 : vector<32x4xi1> to vector<32x4xi1>
    %14 = arith.xori %10, %13 : vector<32x4xi1>
    %15 = arith.andi %14, %8 : vector<32x4xi1>
    %16 = vector.broadcast %4 : i32 to vector<32x4xi32>
    %17 = arith.addi %6, %16 : vector<32x4xi32>
    %18 = arith.select %15, %17, %6 : vector<32x4xi1>, vector<32x4xi32>
    %c0_i32_6 = arith.constant 0 : i32
    %19 = vector.broadcast %c0_i32_6 : i32 to vector<32x4xi32>
    %20 = arith.cmpi ne, %18, %19 : vector<32x4xi32>
    %21 = arith.extui %20 : vector<32x4xi1> to vector<32x4xi32>
    %22 = arith.sitofp %21 : vector<32x4xi32> to vector<32x4xf32>
    %c15_i32 = arith.constant 15 : i32
    %23 = vector.broadcast %c15_i32 : i32 to vector<32x4xi32>
    %24 = arith.cmpi ne, %18, %23 : vector<32x4xi32>
    %25 = arith.extui %24 : vector<32x4xi1> to vector<32x4xi32>
    %26 = arith.sitofp %25 : vector<32x4xi32> to vector<32x4xf32>
    %27 = tpu.iota {dimensions = array<i32: 0>} : vector<32x128xi32>
    %c16_i32_7 = arith.constant 16 : i32
    %c0_i32_8 = arith.constant 0 : i32
    %28 = arith.cmpi eq, %c16_i32_7, %c0_i32_8 : i32
    %c1_i32_9 = arith.constant 1 : i32
    %29 = arith.select %28, %c1_i32_9, %c16_i32_7 : i32
    %30 = vector.broadcast %29 : i32 to vector<32x128xi32>
    %31 = arith.remsi %27, %30 : vector<32x128xi32>
    %c0_i32_10 = arith.constant 0 : i32
    %32 = vector.broadcast %c0_i32_10 : i32 to vector<32x128xi32>
    %33 = arith.cmpi ne, %31, %32 : vector<32x128xi32>
    %c0_i32_11 = arith.constant 0 : i32
    %34 = vector.broadcast %c0_i32_11 : i32 to vector<32x128xi32>
    %35 = arith.cmpi slt, %31, %34 : vector<32x128xi32>
    %c0_i32_12 = arith.constant 0 : i32
    %36 = arith.cmpi slt, %29, %c0_i32_12 : i32
    %37 = vector.broadcast %36 : i1 to vector<32x128xi1>
    %38 = vector.broadcast %37 : vector<32x128xi1> to vector<32x128xi1>
    %39 = arith.xori %35, %38 : vector<32x128xi1>
    %40 = arith.andi %39, %33 : vector<32x128xi1>
    %41 = vector.broadcast %29 : i32 to vector<32x128xi32>
    %42 = arith.addi %31, %41 : vector<32x128xi32>
    %43 = arith.select %40, %42, %31 : vector<32x128xi1>, vector<32x128xi32>
    %c0_i32_13 = arith.constant 0 : i32
    %44 = vector.broadcast %c0_i32_13 : i32 to vector<32x128xi32>
    %45 = arith.cmpi ne, %43, %44 : vector<32x128xi32>
    %46 = arith.extui %45 : vector<32x128xi1> to vector<32x128xi32>
    %47 = arith.sitofp %46 : vector<32x128xi32> to vector<32x128xf32>
    %c15_i32_14 = arith.constant 15 : i32
    %48 = vector.broadcast %c15_i32_14 : i32 to vector<32x128xi32>
    %49 = arith.cmpi ne, %43, %48 : vector<32x128xi32>
    %50 = arith.extui %49 : vector<32x128xi1> to vector<32x128xi32>
    %51 = arith.sitofp %50 : vector<32x128xi32> to vector<32x128xf32>
    %52 = arith.truncf %0 : vector<32x4xf32> to vector<32x4xbf16>
    %c3 = arith.constant 3 : index
    %c0_15 = arith.constant 0 : index
    %c0_16 = arith.constant 0 : index
    %53 = vector.load %arg1[%c3, %c0_15, %c0_16] : memref<4x4x128xbf16, #tpu.memory_space<vmem>>, vector<1x4x128xbf16>
    %54 = vector.shape_cast %53 : vector<1x4x128xbf16> to vector<4x128xbf16>
    %cst = arith.constant dense<0.000000e+00> : vector<32x128xf32>
    %55 = tpu.matmul %52, %54, %cst {dimension_numbers = #tpu.dot_dimension_numbers<[1], [0], [0], [1], [0, 0, 1, 1], [], []>} : vector<32x4xbf16>, vector<4x128xbf16>, vector<32x128xf32> -> vector<32x128xf32>
    %56 = vector.extract_strided_slice %1 {offsets = [6, 0], sizes = [1, 128], strides = [1, 1]} : vector<12x128xf32> to vector<1x128xf32>
    %57 = vector.extract_strided_slice %1 {offsets = [7, 0], sizes = [1, 128], strides = [1, 1]} : vector<12x128xf32> to vector<1x128xf32>
    %cst_17 = arith.constant dense<0.000000e+00> : vector<128xf32>
    %58 = vector.multi_reduction <add>, %55, %cst_17 [0] : vector<32x128xf32> to vector<128xf32>
    %59 = vector.shape_cast %58 : vector<128xf32> to vector<1x128xf32>
    %cst_18 = arith.constant 3.200000e+01 : f32
    %60 = vector.broadcast %cst_18 : f32 to vector<1x128xf32>
    %61 = arith.divf %59, %60 : vector<1x128xf32>
    %62 = arith.mulf %55, %55 : vector<32x128xf32>
    %cst_19 = arith.constant dense<0.000000e+00> : vector<128xf32>
    %63 = vector.multi_reduction <add>, %62, %cst_19 [0] : vector<32x128xf32> to vector<128xf32>
    %64 = vector.shape_cast %63 : vector<128xf32> to vector<1x128xf32>
    %cst_20 = arith.constant 3.200000e+01 : f32
    %65 = vector.broadcast %cst_20 : f32 to vector<1x128xf32>
    %66 = arith.divf %64, %65 : vector<1x128xf32>
    %67 = arith.mulf %61, %61 : vector<1x128xf32>
    %68 = arith.subf %66, %67 : vector<1x128xf32>
    %cst_21 = arith.constant 0.000000e+00 : f32
    %69 = vector.broadcast %cst_21 : f32 to vector<1x128xf32>
    %70 = arith.maximumf %68, %69 : vector<1x128xf32>
    %71 = vector.broadcast %61 : vector<1x128xf32> to vector<32x128xf32>
    %72 = arith.subf %55, %71 : vector<32x128xf32>
    %cst_22 = arith.constant 9.99999974E-6 : f32
    %73 = vector.broadcast %cst_22 : f32 to vector<1x128xf32>
    %74 = arith.addf %70, %73 : vector<1x128xf32>
    %75 = math.rsqrt %74 : vector<1x128xf32>
    %76 = vector.broadcast %75 : vector<1x128xf32> to vector<32x128xf32>
    %77 = arith.mulf %72, %76 : vector<32x128xf32>
    %78 = vector.broadcast %56 : vector<1x128xf32> to vector<32x128xf32>
    %79 = arith.mulf %77, %78 : vector<32x128xf32>
    %80 = vector.broadcast %57 : vector<1x128xf32> to vector<32x128xf32>
    %81 = arith.addf %79, %80 : vector<32x128xf32>
    %c0_23 = arith.constant 0 : index
    %c0_24 = arith.constant 0 : index
    %c0_25 = arith.constant 0 : index
    %82 = vector.load %arg1[%c0_23, %c0_24, %c0_25] : memref<4x4x128xbf16, #tpu.memory_space<vmem>>, vector<1x4x128xbf16>
    %83 = vector.shape_cast %82 : vector<1x4x128xbf16> to vector<4x128xbf16>
    %c1 = arith.constant 1 : index
    %c0_26 = arith.constant 0 : index
    %c0_27 = arith.constant 0 : index
    %84 = vector.load %arg1[%c1, %c0_26, %c0_27] : memref<4x4x128xbf16, #tpu.memory_space<vmem>>, vector<1x4x128xbf16>
    %85 = vector.shape_cast %84 : vector<1x4x128xbf16> to vector<4x128xbf16>
    %c2 = arith.constant 2 : index
    %c0_28 = arith.constant 0 : index
    %c0_29 = arith.constant 0 : index
    %86 = vector.load %arg1[%c2, %c0_28, %c0_29] : memref<4x4x128xbf16, #tpu.memory_space<vmem>>, vector<1x4x128xbf16>
    %87 = vector.shape_cast %86 : vector<1x4x128xbf16> to vector<4x128xbf16>
    %c1_i32_30 = arith.constant 1 : i32
    %88 = tpu.dynamic_rotate %0 by %c1_i32_30 dim 0 : vector<32x4xf32>, i32 -> vector<32x4xf32>
    %89 = arith.mulf %88, %22 : vector<32x4xf32>
    %c31_i32 = arith.constant 31 : i32
    %90 = tpu.dynamic_rotate %0 by %c31_i32 dim 0 : vector<32x4xf32>, i32 -> vector<32x4xf32>
    %91 = arith.mulf %90, %26 : vector<32x4xf32>
    %92 = arith.truncf %89 : vector<32x4xf32> to vector<32x4xbf16>
    %cst_31 = arith.constant dense<0.000000e+00> : vector<32x128xf32>
    %93 = tpu.matmul %92, %83, %cst_31 {dimension_numbers = #tpu.dot_dimension_numbers<[1], [0], [0], [1], [0, 0, 1, 1], [], []>} : vector<32x4xbf16>, vector<4x128xbf16>, vector<32x128xf32> -> vector<32x128xf32>
    %cst_32 = arith.constant dense<0.000000e+00> : vector<32x128xf32>
    %94 = tpu.matmul %52, %85, %cst_32 {dimension_numbers = #tpu.dot_dimension_numbers<[1], [0], [0], [1], [0, 0, 1, 1], [], []>} : vector<32x4xbf16>, vector<4x128xbf16>, vector<32x128xf32> -> vector<32x128xf32>
    %95 = arith.addf %93, %94 : vector<32x128xf32>
    %96 = arith.truncf %91 : vector<32x4xf32> to vector<32x4xbf16>
    %cst_33 = arith.constant dense<0.000000e+00> : vector<32x128xf32>
    %97 = tpu.matmul %96, %87, %cst_33 {dimension_numbers = #tpu.dot_dimension_numbers<[1], [0], [0], [1], [0, 0, 1, 1], [], []>} : vector<32x4xbf16>, vector<4x128xbf16>, vector<32x128xf32> -> vector<32x128xf32>
    %98 = arith.addf %95, %97 : vector<32x128xf32>
    %99 = vector.extract_strided_slice %1 {offsets = [0, 0], sizes = [1, 128], strides = [1, 1]} : vector<12x128xf32> to vector<1x128xf32>
    %100 = vector.extract_strided_slice %1 {offsets = [1, 0], sizes = [1, 128], strides = [1, 1]} : vector<12x128xf32> to vector<1x128xf32>
    %cst_34 = arith.constant dense<0.000000e+00> : vector<128xf32>
    %101 = vector.multi_reduction <add>, %98, %cst_34 [0] : vector<32x128xf32> to vector<128xf32>
    %102 = vector.shape_cast %101 : vector<128xf32> to vector<1x128xf32>
    %cst_35 = arith.constant 3.200000e+01 : f32
    %103 = vector.broadcast %cst_35 : f32 to vector<1x128xf32>
    %104 = arith.divf %102, %103 : vector<1x128xf32>
    %105 = arith.mulf %98, %98 : vector<32x128xf32>
    %cst_36 = arith.constant dense<0.000000e+00> : vector<128xf32>
    %106 = vector.multi_reduction <add>, %105, %cst_36 [0] : vector<32x128xf32> to vector<128xf32>
    %107 = vector.shape_cast %106 : vector<128xf32> to vector<1x128xf32>
    %cst_37 = arith.constant 3.200000e+01 : f32
    %108 = vector.broadcast %cst_37 : f32 to vector<1x128xf32>
    %109 = arith.divf %107, %108 : vector<1x128xf32>
    %110 = arith.mulf %104, %104 : vector<1x128xf32>
    %111 = arith.subf %109, %110 : vector<1x128xf32>
    %cst_38 = arith.constant 0.000000e+00 : f32
    %112 = vector.broadcast %cst_38 : f32 to vector<1x128xf32>
    %113 = arith.maximumf %111, %112 : vector<1x128xf32>
    %114 = vector.broadcast %104 : vector<1x128xf32> to vector<32x128xf32>
    %115 = arith.subf %98, %114 : vector<32x128xf32>
    %cst_39 = arith.constant 9.99999974E-6 : f32
    %116 = vector.broadcast %cst_39 : f32 to vector<1x128xf32>
    %117 = arith.addf %113, %116 : vector<1x128xf32>
    %118 = math.rsqrt %117 : vector<1x128xf32>
    %119 = vector.broadcast %118 : vector<1x128xf32> to vector<32x128xf32>
    %120 = arith.mulf %115, %119 : vector<32x128xf32>
    %121 = vector.broadcast %99 : vector<1x128xf32> to vector<32x128xf32>
    %122 = arith.mulf %120, %121 : vector<32x128xf32>
    %123 = vector.broadcast %100 : vector<1x128xf32> to vector<32x128xf32>
    %124 = arith.addf %122, %123 : vector<32x128xf32>
    %cst_40 = arith.constant 0.000000e+00 : f32
    %125 = vector.broadcast %cst_40 : f32 to vector<32x128xf32>
    %126 = arith.maximumf %124, %125 : vector<32x128xf32>
    %127 = arith.truncf %126 : vector<32x128xf32> to vector<32x128xbf16>
    %c0_41 = arith.constant 0 : index
    %c0_42 = arith.constant 0 : index
    %c0_43 = arith.constant 0 : index
    %128 = vector.load %arg2[%c0_41, %c0_42, %c0_43] : memref<6x128x128xbf16, #tpu.memory_space<vmem>>, vector<1x128x128xbf16>
    %129 = vector.shape_cast %128 : vector<1x128x128xbf16> to vector<128x128xbf16>
    %c1_44 = arith.constant 1 : index
    %c0_45 = arith.constant 0 : index
    %c0_46 = arith.constant 0 : index
    %130 = vector.load %arg2[%c1_44, %c0_45, %c0_46] : memref<6x128x128xbf16, #tpu.memory_space<vmem>>, vector<1x128x128xbf16>
    %131 = vector.shape_cast %130 : vector<1x128x128xbf16> to vector<128x128xbf16>
    %c2_47 = arith.constant 2 : index
    %c0_48 = arith.constant 0 : index
    %c0_49 = arith.constant 0 : index
    %132 = vector.load %arg2[%c2_47, %c0_48, %c0_49] : memref<6x128x128xbf16, #tpu.memory_space<vmem>>, vector<1x128x128xbf16>
    %133 = vector.shape_cast %132 : vector<1x128x128xbf16> to vector<128x128xbf16>
    %c1_i32_50 = arith.constant 1 : i32
    %134 = tpu.dynamic_rotate %126 by %c1_i32_50 dim 0 : vector<32x128xf32>, i32 -> vector<32x128xf32>
    %135 = arith.mulf %134, %47 : vector<32x128xf32>
    %c31_i32_51 = arith.constant 31 : i32
    %136 = tpu.dynamic_rotate %126 by %c31_i32_51 dim 0 : vector<32x128xf32>, i32 -> vector<32x128xf32>
    %137 = arith.mulf %136, %51 : vector<32x128xf32>
    %138 = arith.truncf %135 : vector<32x128xf32> to vector<32x128xbf16>
    %cst_52 = arith.constant dense<0.000000e+00> : vector<32x128xf32>
    %139 = tpu.matmul %138, %129, %cst_52 {dimension_numbers = #tpu.dot_dimension_numbers<[1], [0], [0], [1], [0, 0, 1, 1], [], []>} : vector<32x128xbf16>, vector<128x128xbf16>, vector<32x128xf32> -> vector<32x128xf32>
    %cst_53 = arith.constant dense<0.000000e+00> : vector<32x128xf32>
    %140 = tpu.matmul %127, %131, %cst_53 {dimension_numbers = #tpu.dot_dimension_numbers<[1], [0], [0], [1], [0, 0, 1, 1], [], []>} : vector<32x128xbf16>, vector<128x128xbf16>, vector<32x128xf32> -> vector<32x128xf32>
    %141 = arith.addf %139, %140 : vector<32x128xf32>
    %142 = arith.truncf %137 : vector<32x128xf32> to vector<32x128xbf16>
    %cst_54 = arith.constant dense<0.000000e+00> : vector<32x128xf32>
    %143 = tpu.matmul %142, %133, %cst_54 {dimension_numbers = #tpu.dot_dimension_numbers<[1], [0], [0], [1], [0, 0, 1, 1], [], []>} : vector<32x128xbf16>, vector<128x128xbf16>, vector<32x128xf32> -> vector<32x128xf32>
    %144 = arith.addf %141, %143 : vector<32x128xf32>
    %145 = vector.extract_strided_slice %1 {offsets = [2, 0], sizes = [1, 128], strides = [1, 1]} : vector<12x128xf32> to vector<1x128xf32>
    %146 = vector.extract_strided_slice %1 {offsets = [3, 0], sizes = [1, 128], strides = [1, 1]} : vector<12x128xf32> to vector<1x128xf32>
    %cst_55 = arith.constant dense<0.000000e+00> : vector<128xf32>
    %147 = vector.multi_reduction <add>, %144, %cst_55 [0] : vector<32x128xf32> to vector<128xf32>
    %148 = vector.shape_cast %147 : vector<128xf32> to vector<1x128xf32>
    %cst_56 = arith.constant 3.200000e+01 : f32
    %149 = vector.broadcast %cst_56 : f32 to vector<1x128xf32>
    %150 = arith.divf %148, %149 : vector<1x128xf32>
    %151 = arith.mulf %144, %144 : vector<32x128xf32>
    %cst_57 = arith.constant dense<0.000000e+00> : vector<128xf32>
    %152 = vector.multi_reduction <add>, %151, %cst_57 [0] : vector<32x128xf32> to vector<128xf32>
    %153 = vector.shape_cast %152 : vector<128xf32> to vector<1x128xf32>
    %cst_58 = arith.constant 3.200000e+01 : f32
    %154 = vector.broadcast %cst_58 : f32 to vector<1x128xf32>
    %155 = arith.divf %153, %154 : vector<1x128xf32>
    %156 = arith.mulf %150, %150 : vector<1x128xf32>
    %157 = arith.subf %155, %156 : vector<1x128xf32>
    %cst_59 = arith.constant 0.000000e+00 : f32
    %158 = vector.broadcast %cst_59 : f32 to vector<1x128xf32>
    %159 = arith.maximumf %157, %158 : vector<1x128xf32>
    %160 = vector.broadcast %150 : vector<1x128xf32> to vector<32x128xf32>
    %161 = arith.subf %144, %160 : vector<32x128xf32>
    %cst_60 = arith.constant 9.99999974E-6 : f32
    %162 = vector.broadcast %cst_60 : f32 to vector<1x128xf32>
    %163 = arith.addf %159, %162 : vector<1x128xf32>
    %164 = math.rsqrt %163 : vector<1x128xf32>
    %165 = vector.broadcast %164 : vector<1x128xf32> to vector<32x128xf32>
    %166 = arith.mulf %161, %165 : vector<32x128xf32>
    %167 = vector.broadcast %145 : vector<1x128xf32> to vector<32x128xf32>
    %168 = arith.mulf %166, %167 : vector<32x128xf32>
    %169 = vector.broadcast %146 : vector<1x128xf32> to vector<32x128xf32>
    %170 = arith.addf %168, %169 : vector<32x128xf32>
    %cst_61 = arith.constant 0.000000e+00 : f32
    %171 = vector.broadcast %cst_61 : f32 to vector<32x128xf32>
    %172 = arith.maximumf %170, %171 : vector<32x128xf32>
    %173 = arith.truncf %172 : vector<32x128xf32> to vector<32x128xbf16>
    %c3_62 = arith.constant 3 : index
    %c0_63 = arith.constant 0 : index
    %c0_64 = arith.constant 0 : index
    %174 = vector.load %arg2[%c3_62, %c0_63, %c0_64] : memref<6x128x128xbf16, #tpu.memory_space<vmem>>, vector<1x128x128xbf16>
    %175 = vector.shape_cast %174 : vector<1x128x128xbf16> to vector<128x128xbf16>
    %c4 = arith.constant 4 : index
    %c0_65 = arith.constant 0 : index
    %c0_66 = arith.constant 0 : index
    %176 = vector.load %arg2[%c4, %c0_65, %c0_66] : memref<6x128x128xbf16, #tpu.memory_space<vmem>>, vector<1x128x128xbf16>
    %177 = vector.shape_cast %176 : vector<1x128x128xbf16> to vector<128x128xbf16>
    %c5 = arith.constant 5 : index
    %c0_67 = arith.constant 0 : index
    %c0_68 = arith.constant 0 : index
    %178 = vector.load %arg2[%c5, %c0_67, %c0_68] : memref<6x128x128xbf16, #tpu.memory_space<vmem>>, vector<1x128x128xbf16>
    %179 = vector.shape_cast %178 : vector<1x128x128xbf16> to vector<128x128xbf16>
    %c1_i32_69 = arith.constant 1 : i32
    %180 = tpu.dynamic_rotate %172 by %c1_i32_69 dim 0 : vector<32x128xf32>, i32 -> vector<32x128xf32>
    %181 = arith.mulf %180, %47 : vector<32x128xf32>
    %c31_i32_70 = arith.constant 31 : i32
    %182 = tpu.dynamic_rotate %172 by %c31_i32_70 dim 0 : vector<32x128xf32>, i32 -> vector<32x128xf32>
    %183 = arith.mulf %182, %51 : vector<32x128xf32>
    %184 = arith.truncf %181 : vector<32x128xf32> to vector<32x128xbf16>
    %cst_71 = arith.constant dense<0.000000e+00> : vector<32x128xf32>
    %185 = tpu.matmul %184, %175, %cst_71 {dimension_numbers = #tpu.dot_dimension_numbers<[1], [0], [0], [1], [0, 0, 1, 1], [], []>} : vector<32x128xbf16>, vector<128x128xbf16>, vector<32x128xf32> -> vector<32x128xf32>
    %cst_72 = arith.constant dense<0.000000e+00> : vector<32x128xf32>
    %186 = tpu.matmul %173, %177, %cst_72 {dimension_numbers = #tpu.dot_dimension_numbers<[1], [0], [0], [1], [0, 0, 1, 1], [], []>} : vector<32x128xbf16>, vector<128x128xbf16>, vector<32x128xf32> -> vector<32x128xf32>
    %187 = arith.addf %185, %186 : vector<32x128xf32>
    %188 = arith.truncf %183 : vector<32x128xf32> to vector<32x128xbf16>
    %cst_73 = arith.constant dense<0.000000e+00> : vector<32x128xf32>
    %189 = tpu.matmul %188, %179, %cst_73 {dimension_numbers = #tpu.dot_dimension_numbers<[1], [0], [0], [1], [0, 0, 1, 1], [], []>} : vector<32x128xbf16>, vector<128x128xbf16>, vector<32x128xf32> -> vector<32x128xf32>
    %190 = arith.addf %187, %189 : vector<32x128xf32>
    %191 = vector.extract_strided_slice %1 {offsets = [4, 0], sizes = [1, 128], strides = [1, 1]} : vector<12x128xf32> to vector<1x128xf32>
    %192 = vector.extract_strided_slice %1 {offsets = [5, 0], sizes = [1, 128], strides = [1, 1]} : vector<12x128xf32> to vector<1x128xf32>
    %cst_74 = arith.constant dense<0.000000e+00> : vector<128xf32>
    %193 = vector.multi_reduction <add>, %190, %cst_74 [0] : vector<32x128xf32> to vector<128xf32>
    %194 = vector.shape_cast %193 : vector<128xf32> to vector<1x128xf32>
    %cst_75 = arith.constant 3.200000e+01 : f32
    %195 = vector.broadcast %cst_75 : f32 to vector<1x128xf32>
    %196 = arith.divf %194, %195 : vector<1x128xf32>
    %197 = arith.mulf %190, %190 : vector<32x128xf32>
    %cst_76 = arith.constant dense<0.000000e+00> : vector<128xf32>
    %198 = vector.multi_reduction <add>, %197, %cst_76 [0] : vector<32x128xf32> to vector<128xf32>
    %199 = vector.shape_cast %198 : vector<128xf32> to vector<1x128xf32>
    %cst_77 = arith.constant 3.200000e+01 : f32
    %200 = vector.broadcast %cst_77 : f32 to vector<1x128xf32>
    %201 = arith.divf %199, %200 : vector<1x128xf32>
    %202 = arith.mulf %196, %196 : vector<1x128xf32>
    %203 = arith.subf %201, %202 : vector<1x128xf32>
    %cst_78 = arith.constant 0.000000e+00 : f32
    %204 = vector.broadcast %cst_78 : f32 to vector<1x128xf32>
    %205 = arith.maximumf %203, %204 : vector<1x128xf32>
    %206 = vector.broadcast %196 : vector<1x128xf32> to vector<32x128xf32>
    %207 = arith.subf %190, %206 : vector<32x128xf32>
    %cst_79 = arith.constant 9.99999974E-6 : f32
    %208 = vector.broadcast %cst_79 : f32 to vector<1x128xf32>
    %209 = arith.addf %205, %208 : vector<1x128xf32>
    %210 = math.rsqrt %209 : vector<1x128xf32>
    %211 = vector.broadcast %210 : vector<1x128xf32> to vector<32x128xf32>
    %212 = arith.mulf %207, %211 : vector<32x128xf32>
    %213 = vector.broadcast %191 : vector<1x128xf32> to vector<32x128xf32>
    %214 = arith.mulf %212, %213 : vector<32x128xf32>
    %215 = vector.broadcast %192 : vector<1x128xf32> to vector<32x128xf32>
    %216 = arith.addf %214, %215 : vector<32x128xf32>
    %cst_80 = arith.constant 0.000000e+00 : f32
    %217 = vector.broadcast %cst_80 : f32 to vector<32x128xf32>
    %218 = arith.maximumf %216, %217 : vector<32x128xf32>
    %219 = arith.addf %126, %172 : vector<32x128xf32>
    %220 = arith.addf %219, %218 : vector<32x128xf32>
    %221 = vector.extract_strided_slice %1 {offsets = [8, 0], sizes = [1, 128], strides = [1, 1]} : vector<12x128xf32> to vector<1x128xf32>
    %222 = vector.extract_strided_slice %1 {offsets = [9, 0], sizes = [1, 128], strides = [1, 1]} : vector<12x128xf32> to vector<1x128xf32>
    %cst_81 = arith.constant dense<0.000000e+00> : vector<128xf32>
    %223 = vector.multi_reduction <add>, %220, %cst_81 [0] : vector<32x128xf32> to vector<128xf32>
    %224 = vector.shape_cast %223 : vector<128xf32> to vector<1x128xf32>
    %cst_82 = arith.constant 3.200000e+01 : f32
    %225 = vector.broadcast %cst_82 : f32 to vector<1x128xf32>
    %226 = arith.divf %224, %225 : vector<1x128xf32>
    %227 = arith.mulf %220, %220 : vector<32x128xf32>
    %cst_83 = arith.constant dense<0.000000e+00> : vector<128xf32>
    %228 = vector.multi_reduction <add>, %227, %cst_83 [0] : vector<32x128xf32> to vector<128xf32>
    %229 = vector.shape_cast %228 : vector<128xf32> to vector<1x128xf32>
    %cst_84 = arith.constant 3.200000e+01 : f32
    %230 = vector.broadcast %cst_84 : f32 to vector<1x128xf32>
    %231 = arith.divf %229, %230 : vector<1x128xf32>
    %232 = arith.mulf %226, %226 : vector<1x128xf32>
    %233 = arith.subf %231, %232 : vector<1x128xf32>
    %cst_85 = arith.constant 0.000000e+00 : f32
    %234 = vector.broadcast %cst_85 : f32 to vector<1x128xf32>
    %235 = arith.maximumf %233, %234 : vector<1x128xf32>
    %236 = vector.broadcast %226 : vector<1x128xf32> to vector<32x128xf32>
    %237 = arith.subf %220, %236 : vector<32x128xf32>
    %cst_86 = arith.constant 9.99999974E-6 : f32
    %238 = vector.broadcast %cst_86 : f32 to vector<1x128xf32>
    %239 = arith.addf %235, %238 : vector<1x128xf32>
    %240 = math.rsqrt %239 : vector<1x128xf32>
    %241 = vector.broadcast %240 : vector<1x128xf32> to vector<32x128xf32>
    %242 = arith.mulf %237, %241 : vector<32x128xf32>
    %243 = vector.broadcast %221 : vector<1x128xf32> to vector<32x128xf32>
    %244 = arith.mulf %242, %243 : vector<32x128xf32>
    %245 = vector.broadcast %222 : vector<1x128xf32> to vector<32x128xf32>
    %246 = arith.addf %244, %245 : vector<32x128xf32>
    %247 = arith.addf %246, %81 : vector<32x128xf32>
    %cst_87 = arith.constant 0.000000e+00 : f32
    %248 = vector.broadcast %cst_87 : f32 to vector<32x128xf32>
    %249 = arith.maximumf %247, %248 : vector<32x128xf32>
    %250 = vector.extract_strided_slice %1 {offsets = [10, 0], sizes = [1, 128], strides = [1, 1]} : vector<12x128xf32> to vector<1x128xf32>
    %251 = vector.extract_strided_slice %1 {offsets = [11, 0], sizes = [1, 128], strides = [1, 1]} : vector<12x128xf32> to vector<1x128xf32>
    %cst_88 = arith.constant dense<0.000000e+00> : vector<128xf32>
    %252 = vector.multi_reduction <add>, %249, %cst_88 [0] : vector<32x128xf32> to vector<128xf32>
    %253 = vector.shape_cast %252 : vector<128xf32> to vector<1x128xf32>
    %cst_89 = arith.constant 3.200000e+01 : f32
    %254 = vector.broadcast %cst_89 : f32 to vector<1x128xf32>
    %255 = arith.divf %253, %254 : vector<1x128xf32>
    %256 = arith.mulf %249, %249 : vector<32x128xf32>
    %cst_90 = arith.constant dense<0.000000e+00> : vector<128xf32>
    %257 = vector.multi_reduction <add>, %256, %cst_90 [0] : vector<32x128xf32> to vector<128xf32>
    %258 = vector.shape_cast %257 : vector<128xf32> to vector<1x128xf32>
    %cst_91 = arith.constant 3.200000e+01 : f32
    %259 = vector.broadcast %cst_91 : f32 to vector<1x128xf32>
    %260 = arith.divf %258, %259 : vector<1x128xf32>
    %261 = arith.mulf %255, %255 : vector<1x128xf32>
    %262 = arith.subf %260, %261 : vector<1x128xf32>
    %cst_92 = arith.constant 0.000000e+00 : f32
    %263 = vector.broadcast %cst_92 : f32 to vector<1x128xf32>
    %264 = arith.maximumf %262, %263 : vector<1x128xf32>
    %265 = vector.broadcast %255 : vector<1x128xf32> to vector<32x128xf32>
    %266 = arith.subf %249, %265 : vector<32x128xf32>
    %cst_93 = arith.constant 9.99999974E-6 : f32
    %267 = vector.broadcast %cst_93 : f32 to vector<1x128xf32>
    %268 = arith.addf %264, %267 : vector<1x128xf32>
    %269 = math.rsqrt %268 : vector<1x128xf32>
    %270 = vector.broadcast %269 : vector<1x128xf32> to vector<32x128xf32>
    %271 = arith.mulf %266, %270 : vector<32x128xf32>
    %272 = vector.broadcast %250 : vector<1x128xf32> to vector<32x128xf32>
    %273 = arith.mulf %271, %272 : vector<32x128xf32>
    %274 = vector.broadcast %251 : vector<1x128xf32> to vector<32x128xf32>
    %275 = arith.addf %273, %274 : vector<32x128xf32>
    %c0_94 = arith.constant 0 : index
    %c0_95 = arith.constant 0 : index
    %276 = vector.load %arg4[%c0_94, %c0_95] : memref<32x128xf32, #tpu.memory_space<vmem>>, vector<32x128xf32>
    tpu.vector_store %arg4[%c0_94, %c0_95], %275 {strides = array<i32>} : memref<32x128xf32, #tpu.memory_space<vmem>>, vector<32x128xf32>,
    return
  }
}

</mosaic_0001>

<bundles_post_ra>
// kernel: tpu_custom_call.1
= control target key start
LH: loop header
LB: loop body
LE: loop exit
PB: predicated region body
PF: predicated region fallthrough
CT: control target
= control target key end

     0   :  { %9 = vsyncpa [#allocation3], 0  ;;  %s1900_s0 = inlined_call_operand.vmem [shape: f32[32,4], index: 0, kind: input, shape index: {}]   ;;  %s1901_s1 = inlined_call_operand.vmem [shape: bf16[4,4,128], index: 1, kind: input, shape index: {}]   ;;  %s1902_s2 = inlined_call_operand.hbm [shape: bf16[6,128,128], index: 2, kind: input, shape index: {}]   ;;  %s1903_s3 = inlined_call_operand.vmem [shape: f32[12,128], index: 3, kind: input, shape index: {}]   ;;  %s1904_s4 = inlined_call_operand.hbm [shape: f32[32,128], index: 4, kind: output, shape index: {}]  }
   0x1   :  { %10 = vsyncpa [#allocation4], 0  ;;  %s19_s17 = sshll.u32 %s1902_s2, 4  ;;  %s1579_s18 = smov [#allocation2]   ;;  %s20_s17 = int_to_ptr.hbm [resolvable:$true] %s19_s17 }
   0x2   :  { %s21_s19 = sshll.u32 %s1579_s18, 4  ;;  %s1580_s20 = smov 64   ;;  %s22_s19 = int_to_ptr.vmem [resolvable:$true] %s21_s19 }
   0x3   :  { %s1581_s21 = smov 4  }
   0x4   :  { %27 = dma.hbm_to_vmem [thread:$0]  %s20_s17, 6144, %s22_s19, [#allocation3], %s1580_s20, %s1580_s20, %s1581_s21  }
   0x5   :  { %1575 = dma.done.wait [#allocation3], 6144  }
   0x6   :  { %1576 = vsyncadd [#allocation3], 4294961152  ;;  %v41_v0 = vlaneseq  ;;  %vm129_vm0 = vcmask 1041408   ;;  %vm122_vm1 = vcmask 31744   ;;  %v1241_v6 = vld [vmem:[%s1901_s1 + $0x2] sm:$0x3] }
   0x7   :  { %v215_v7 = vld [vmem:[%s1901_s1] sm:$0x3]  ;;  %v1242_v8 = vld [vmem:[%s1901_s1 + $0x4] sm:$0x3]  ;;  %v249_v9 = vsel %vm129_vm0, %v1241_v6, 0  ;;  %v36_v13 = vld [vmem:[%s1900_s0 + $0x8] sm:$0xff] }
   0x8   :  { %v1615_v1 = vshrl.u32 %v41_v0, 7  ;;  %v277_v10 = vsel %vm129_vm0, %v215_v7, 0  ;;  %v307_v11 = vsel %vm129_vm0, %v1242_v8, 0  ;;  %v35_v12 = vld [vmem:[%s1900_s0] sm:$0xff]  ;;  %v38_v14 = vld [vmem:[%s1900_s0 + $0x18] sm:$0xff]  ;;  %258 = vmatpush.bf16.msra.mxu1 %v249_v9  ;;  %v221_v17 = vrot.slane %v36_v13, 7 }
   0x9   :  { %286 = vmatpush.bf16.msra.mxu2 %v277_v10  ;;  %v118_v15 = vpack.c.bf16 %v36_v13, %v35_v12  ;;  %v220_v16 = vrot.slane %v35_v12, 7  ;;  %v233_v18 = vrot.slane %v35_v12, 1  ;;  %v37_v19 = vld [vmem:[%s1900_s0 + $0x10] sm:$0xff]  ;;  %316 = vmatpush.bf16.msra.mxu3 %v307_v11  ;;  %v234_v20 = vrot.slane %v36_v13, 1  ;;  %v1238_v34 = vld [vmem:[%s1901_s1 + $0x6] sm:$0x3] }
   0xa   :  { %v50_v2 = vand.u32 15, %v1615_v1  ;;  %v43_v3 = vadd.s32 8, %v1615_v1  ;;  %vm224_vm3 = vcmp.lt.s32.totalorder %v1615_v1, 1  ;;  %vm237_vm4 = vcmp.lt.s32.totalorder %v1615_v1, 7  ;;  %v1455_v8 = vld [vmem:[#allocation2 + $0x70] sm:$0xff]  ;;  %v1464_v9 = vld [vmem:[#allocation2 + $0xb8] sm:$0xff] }
   0xb   :  { %v1582_v21 = vmov 0.0   ;;  %v223_v23 = vrot.slane %v38_v14, 7  ;;  %v235_v25 = vrot.slane %v37_v19, 1  ;;  %v44_v26 = vadd.s32 16, %v1615_v1  ;;  %1243 = vmatmul.msk.bf16.vlgmr.msra.gmra.mxu1 %vm122_vm1, %v118_v15  ;;  %v1448_v10 = vld [vmem:[#allocation2 + $0x38] sm:$0xff]  ;;  %s1221_s16 = sshll.u32 %s1904_s4, 4  ;;  %s1222_s16 = int_to_ptr.hbm [resolvable:$true] %s1221_s16 }
   0xc   :  { %vm1619_vm2 = vcmp.ne.s32.totalorder %v50_v2, 0  ;;  %v57_v5 = vand.u32 15, %v43_v3  ;;  %v227_v27 = vsel %vm224_vm3, %v220_v16, %v221_v17  ;;  %v45_v29 = vadd.s32 24, %v1615_v1  ;;  %v1456_v3 = vld [vmem:[#allocation2 + $0x78] sm:$0xff]  ;;  %585 = vmatpush.bf16.msrb.mxu1 %v1448_v10  ;;  %v1457_v10 = vld [vmem:[#allocation2 + $0x80] sm:$0xff]  ;;  %s1585_s17 = smov 128  }
   0xd   :  { %v1651_v22 = vsel %vm1619_vm2, 1.0, %v1582_v21  ;;  %v228_v28 = vsel %vm224_vm3, %v223_v23, %v220_v16  ;;  %v239_v31 = vsel %vm237_vm4, %v234_v20, %v235_v25  ;;  %v240_v32 = vsel %vm237_vm4, %v233_v18, %v234_v20  ;;  %654 = vmatpush.bf16.msrb.mxu2 %v1464_v9  ;;  %s1586_s18 = smov 8  }
   0xe   :  { %vm107_vm5 = vcmp.ne.s32.totalorder %v57_v5, 15  ;;  %v229_v30 = vmul.f32 %v1651_v22, %v228_v28  ;;  %v64_v36 = vand.u32 15, %v44_v26  ;;  %v71_v38 = vand.u32 15, %v45_v29 }
   0xf   :  { %v1653_v24 = vsel %vm107_vm5, 1.0, %v1582_v21  ;;  %v131_v39 = vsel %vm129_vm0, %v1238_v34, 0  ;;  %v222_v40 = vrot.slane %v37_v19, 7  ;;  %v236_v41 = vrot.slane %v38_v14, 1  ;;  %v1446_v34 = vld [vmem:[#allocation2 + $0x28] sm:$0xff] }
  0x10   :  { %v243_v33 = vmul.f32 %v1653_v24, %v239_v31  ;;  %v246_v35 = vpack.c.bf16 %v227_v27, %v229_v30  ;;  %140 = vmatpush.bf16.msra.mxu0 %v131_v39  ;;  %vm96_vm6 = vcmp.ne.s32.totalorder %v64_v36, 0  ;;  %vm109_vm7 = vcmp.ne.s32.totalorder %v71_v38, 15 }
  0x11   :  { %v1675_v42 = vsel %vm96_vm6, 1.0, %v1582_v21  ;;  %v226_v43 = vsel %vm224_vm3, %v221_v17, %v222_v40  ;;  %v1679_v44 = vsel %vm109_vm7, 1.0, %v1582_v21  ;;  %v241_v45 = vsel %vm237_vm4, %v236_v41, %v233_v18  ;;  %v1463_v21 = vld [vmem:[#allocation2 + $0xb0] sm:$0xff] }
  0x12   :  { %v298_v37 = vpack.c.bf16 %v243_v33, %v240_v32  ;;  %1245 = vmatmul.msk.bf16.vlgmr.msra.gmra.mxu2 %vm122_vm1, %v246_v35  ;;  %v119_v46 = vpack.c.bf16 %v38_v14, %v37_v19  ;;  %v231_v47 = vmul.f32 %v1675_v42, %v226_v43  ;;  %v225_v48 = vsel %vm224_vm3, %v222_v40, %v223_v23  ;;  %v1454_v19 = vld [vmem:[#allocation2 + $0x68] sm:$0xff]  ;;  %v1447_v23 = vld [vmem:[#allocation2 + $0x30] sm:$0xff]  ;;  %v1453_v32 = vld [vmem:[#allocation2 + $0x60] sm:$0xff] }
  0x13   :  { %1239 = vmatmul.msk.bf16.vlgmr.msra.gmra.mxu0 %vm122_vm1, %v118_v15  ;;  %v245_v49 = vmul.f32 %v1679_v44, %v241_v45  ;;  %v238_v50 = vsel %vm237_vm4, %v235_v25, %v236_v41  ;;  %v1583_v61 = vmov 32.0   ;;  %655 = vmatpush.bf16.msrb.mxu2 %v1463_v21  ;;  %v1462_v33 = vld [vmem:[#allocation2 + $0xa8] sm:$0xff]  ;;  %v1452_v40 = vld [vmem:[#allocation2 + $0x58] sm:$0xff]  ;;  %v1461_v41 = vld [vmem:[#allocation2 + $0xa0] sm:$0xff] }
  0x14   :  { %1247 = vmatmul.msk.bf16.vlgmr.msra.gmra.mxu3 %vm122_vm1, %v298_v37  ;;  %v247_v51 = vpack.c.bf16 %v225_v48, %v231_v47  ;;  %1513 = vrcp.f32 %v1583_v61  ;;  %518 = vmatpush.bf16.msrb.mxu0 %v1456_v3  ;;  %v1445_v43 = vld [vmem:[#allocation2 + $0x20] sm:$0xff]  ;;  %v1458_v3 = vld [vmem:[#allocation2 + $0x88] sm:$0xff] }
  0x15   :  { %v299_v52 = vpack.c.bf16 %v245_v49, %v238_v50  ;;  %586 = vmatpush.bf16.msrb.mxu1 %v1447_v23  ;;  %v1451_v50 = vld [vmem:[#allocation2 + $0x50] sm:$0xff] }
  0x17   :  { %656 = vmatpush.bf16.msrb.mxu2 %v1462_v33 }
  0x18   :  { %519 = vmatpush.bf16.msrb.mxu0 %v1455_v8 }
  0x19   :  { %587 = vmatpush.bf16.msrb.mxu1 %v1446_v34 }
  0x1a   :  { %v1514_v5 = vpop.eup %1513 }
  0x1b   :  { %1244 = vmatmul.msk.bf16.gmra.mxu1 %vm122_vm1, %v119_v46  ;;  %v162_v14 = vmul.f32 32.0, %v1514_v5  ;;  %657 = vmatpush.bf16.msrb.mxu2 %v1461_v41  ;;  %vm166_vm8 = vweird.f32 %v1514_v5 }
  0x1c   :  { %520 = vmatpush.bf16.msrb.mxu0 %v1454_v19 }
  0x1d   :  { %v163_v28 = vsub.f32 1.0, %v162_v14  ;;  %588 = vmatpush.bf16.msrb.mxu1 %v1445_v43 }
  0x1f   :  { %v164_v37 = vmul.f32 %v1514_v5, %v163_v28 }
  0x20   :  { %521 = vmatpush.bf16.msrb.mxu0 %v1453_v32 }
  0x21   :  { %v165_v47 = vadd.f32 %v1514_v5, %v164_v37 }
  0x22   :  { %1246 = vmatmul.msk.bf16.gmra.mxu2 %vm122_vm1, %v247_v51  ;;  %v1460_v51 = vld [vmem:[#allocation2 + $0x98] sm:$0xff] }
  0x23   :  { %1240 = vmatmul.msk.bf16.gmra.mxu0 %vm122_vm1, %v119_v46  ;;  %658 = vmatpush.bf16.msrb.mxu2 %v1460_v51 }
  0x24   :  { %1248 = vmatmul.msk.bf16.gmra.mxu3 %vm122_vm1, %v299_v52  ;;  %522 = vmatpush.bf16.msrb.mxu0 %v1452_v40  ;;  %v1444_v52 = vld [vmem:[#allocation2 + $0x18] sm:$0xff] }
  0x25   :  { %589 = vmatpush.bf16.msrb.mxu1 %v1444_v52 }
  0x28   :  { %523 = vmatpush.bf16.msrb.mxu0 %v1451_v50 }
  0x88   :  { %v260_v53 = vpop.f32.mrf.mxu1 }
  0x90   :  { %v262_v56 = vpop.f32.mrf.mxu1  ;;  %v1728_v34 = vpop.f32.mrf.mxu0 }
  0x95   :  { %v288_v54 = vpop.f32.mrf.mxu2 }
  0x96   :  { %v289_v63 = vadd.f32 %v288_v54, %v260_v53 }
  0x97   :  { %v318_v55 = vpop.f32.mrf.mxu3 }
  0x98   :  { %v265_v59 = vpop.f32.mrf.mxu1  ;;  %v1695_v6 = vadd.f32 %v318_v55, %v289_v63  ;;  %v1713_v55 = vsel %vm166_vm8, %v1514_v5, %v165_v47  ;;  %v1442_v5 = vld [vmem:[#allocation2 + $0x8] sm:$0xff] }
  0x9a   :  { %v342_v15 = vmul.f32 %v1695_v6, %v1695_v6 }
  0x9d   :  { %v290_v57 = vpop.f32.mrf.mxu2 }
  0x9e   :  { %v291_v60 = vadd.f32 %v290_v57, %v262_v56 }
  0x9f   :  { %v320_v58 = vpop.f32.mrf.mxu3 }
  0xa0   :  { %v1693_v4 = vadd.f32 %v320_v58, %v291_v60  ;;  %v267_v12 = vpop.f32.mrf.mxu1  ;;  %v1450_v58 = vld [vmem:[#allocation2 + $0x48] sm:$0xff]  ;;  %v1443_v60 = vld [vmem:[#allocation2 + $0x10] sm:$0xff] }
  0xa1   :  { %524 = vmatpush.bf16.msrb.mxu0 %v1450_v58  ;;  %590 = vmatpush.bf16.msrb.mxu1 %v1443_v60 }
  0xa2   :  { %v343_v11 = vmul.f32 %v1693_v4, %v1693_v4  ;;  %v332_v16 = vadd.f32 %v1693_v4, %v1695_v6 }
  0xa4   :  { %v346_v25 = vadd.f32 %v343_v11, %v342_v15  ;;  %v1441_v11 = vld [vmem:[#allocation2] sm:$0xff] }
  0xa5   :  { %v293_v62 = vpop.f32.mrf.mxu2  ;;  %591 = vmatpush.bf16.msrb.mxu1 %v1442_v5 }
  0xa6   :  { %v294_v0 = vadd.f32 %v293_v62, %v265_v59  ;;  %v1459_v59 = vld [vmem:[#allocation2 + $0x90] sm:$0xff] }
  0xa7   :  { %v323_v2 = vpop.f32.mrf.mxu3  ;;  %659 = vmatpush.bf16.msrb.mxu2 %v1459_v59 }
  0xa8   :  { %v1697_v7 = vadd.f32 %v323_v2, %v294_v0  ;;  %v1449_v2 = vld [vmem:[#allocation2 + $0x40] sm:$0xff] }
  0xa9   :  { %525 = vmatpush.bf16.msrb.mxu0 %v1449_v2  ;;  %592 = vmatpush.bf16.msrb.mxu1 %v1441_v11 }
  0xaa   :  { %v344_v17 = vmul.f32 %v1697_v7, %v1697_v7  ;;  %v333_v26 = vadd.f32 %v332_v16, %v1697_v7 }
  0xab   :  { %660 = vmatpush.bf16.msrb.mxu2 %v1458_v3 }
  0xac   :  { %v347_v29 = vadd.f32 %v346_v25, %v344_v17  ;;  %v1720_v17 = vld [vmem:[%s1903_s3] sm:$0xff] }
  0xad   :  { %v295_v13 = vpop.f32.mrf.mxu2 }
  0xae   :  { %v296_v18 = vadd.f32 %v295_v13, %v267_v12 }
  0xaf   :  { %v325_v20 = vpop.f32.mrf.mxu3  ;;  %661 = vmatpush.bf16.msrb.mxu2 %v1457_v10 }
  0xb0   :  { %v1708_v27 = vadd.f32 %v325_v20, %v296_v18  ;;  %v378_v20 = vperm.slane %v1720_v17, 0 }
  0xb2   :  { %v334_v30 = vadd.f32 %v333_v26, %v1708_v27  ;;  %v345_v31 = vmul.f32 %v1708_v27, %v1708_v27 }
  0xb4   :  { %v335_v35 = vrot.slane %v334_v30, 4  ;;  %v348_v36 = vadd.f32 %v347_v29, %v345_v31  ;;  %v383_v29 = vperm.slane %v1720_v17, 1 }
  0xb6   :  { %v336_v38 = vadd.f32 %v335_v35, %v334_v30  ;;  %v349_v39 = vrot.slane %v348_v36, 4 }
  0xb8   :  { %v337_v45 = vrot.slane %v336_v38, 2  ;;  %v350_v46 = vadd.f32 %v349_v39, %v348_v36 }
  0xba   :  { %v338_v48 = vadd.f32 %v337_v45, %v336_v38  ;;  %v351_v49 = vrot.slane %v350_v46, 2 }
  0xbc   :  { %v339_v53 = vrot.slane %v338_v48, 1  ;;  %v352_v54 = vadd.f32 %v351_v49, %v350_v46  ;;  %v1743_v49 = vpop.f32.mrf.mxu0 }
  0xbd   :  { %v152_v58 = vadd.f32 %v1743_v49, %v1728_v34 }
  0xbe   :  { %v340_v56 = vadd.f32 %v339_v53, %v338_v48  ;;  %v353_v57 = vrot.slane %v352_v54, 1 }
  0xc0   :  { %v341_v61 = vmul.f32 %v340_v56, %v1713_v55  ;;  %v354_v62 = vadd.f32 %v353_v57, %v352_v54  ;;  %v169_v57 = vmul.f32 %v1728_v34, %v1728_v34 }
  0xc2   :  { %v355_v63 = vmul.f32 %v354_v62, %v1713_v55  ;;  %v356_v0 = vmul.f32 %v341_v61, %v341_v61  ;;  %v359_v21 = vsub.f32 %v1695_v6, %v341_v61  ;;  %v360_v23 = vsub.f32 %v1693_v4, %v341_v61 }
  0xc3   :  { %v361_v25 = vsub.f32 %v1697_v7, %v341_v61  ;;  %v362_v26 = vsub.f32 %v1708_v27, %v341_v61 }
  0xc4   :  { %v357_v8 = vsub.f32 %v355_v63, %v356_v0  ;;  %v170_v63 = vmul.f32 %v1743_v49, %v1743_v49  ;;  %v147_v3 = vpop.f32.mrf.mxu0 }
  0xc5   :  { %v153_v5 = vadd.f32 %v152_v58, %v147_v3 }
  0xc6   :  { %v358_v9 = vmax.f32 %v357_v8, 0.0  ;;  %v173_v2 = vadd.f32 %v170_v63, %v169_v57  ;;  %v171_v8 = vmul.f32 %v147_v3, %v147_v3 }
  0xc8   :  { %v363_v12 = vadd.f32 1e-05, %v358_v9  ;;  %v174_v11 = vadd.f32 %v173_v2, %v171_v8 }
  0xca   :  { %1515 = vrsqrt.f32 %v363_v12  ;;  %vm370_vm10 = vweird.f32 %v363_v12 }
  0xd0   :  { %v1516_v13 = vpop.eup %1515 }
  0xd1   :  { %v365_v14 = vmul.f32 %v1516_v13, %v363_v12  ;;  %vm371_vm9 = vweird.f32 %v1516_v13 }
  0xd2   :  { %vm372_vm11 = vmor %vm370_vm10, %vm371_vm9 }
  0xd3   :  { %v366_v15 = vmul.f32 %v1516_v13, %v365_v14 }
  0xd5   :  { %v367_v16 = vmul.f32 0.5, %v366_v15  ;;  %v149_v15 = vpop.f32.mrf.mxu0 }
  0xd7   :  { %v368_v18 = vsub.f32 1.5, %v367_v16 }
  0xd9   :  { %v369_v19 = vmul.f32 %v1516_v13, %v368_v18  ;;  %v154_v18 = vadd.f32 %v153_v5, %v149_v15 }
  0xdb   :  { %v373_v28 = vsel %vm372_vm11, %v1516_v13, %v369_v19  ;;  %v172_v19 = vmul.f32 %v149_v15, %v149_v15 }
  0xdc   :  { %v374_v30 = vmul.f32 %v373_v28, %v359_v21  ;;  %v375_v31 = vmul.f32 %v373_v28, %v360_v23  ;;  %v376_v32 = vmul.f32 %v373_v28, %v361_v25  ;;  %v377_v33 = vmul.f32 %v373_v28, %v362_v26 }
  0xdd   :  { %v155_v21 = vrot.slane %v154_v18, 4  ;;  %v175_v23 = vadd.f32 %v174_v11, %v172_v19 }
  0xde   :  { %v381_v35 = vmul.f32 %v378_v20, %v376_v32  ;;  %v382_v36 = vmul.f32 %v378_v20, %v377_v33  ;;  %v379_v37 = vmul.f32 %v378_v20, %v374_v30  ;;  %v380_v6 = vmul.f32 %v378_v20, %v375_v31 }
  0xdf   :  { %v176_v30 = vrot.slane %v175_v23, 4 }
  0xe0   :  { %v386_v38 = vadd.f32 %v383_v29, %v381_v35  ;;  %v387_v4 = vadd.f32 %v383_v29, %v382_v36  ;;  %v384_v39 = vadd.f32 %v383_v29, %v379_v37  ;;  %v385_v7 = vadd.f32 %v383_v29, %v380_v6 }
  0xe1   :  { %v156_v29 = vadd.f32 %v155_v21, %v154_v18  ;;  %v177_v33 = vadd.f32 %v176_v30, %v175_v23 }
  0xe2   :  { %v1730_v40 = vmax.f32 %v387_v4, 0.0  ;;  %v1732_v27 = vmax.f32 %v384_v39, 0.0  ;;  %v1734_v41 = vmax.f32 %v385_v7, 0.0  ;;  %v1736_v43 = vmax.f32 %v386_v38, 0.0 }
  0xe3   :  { %v157_v32 = vrot.slane %v156_v29, 2  ;;  %v178_v36 = vrot.slane %v177_v33, 2 }
  0xe4   :  { %v392_v45 = vpack.c.bf16 %v1734_v41, %v1732_v27  ;;  %v444_v46 = vrot.slane %v1732_v27, 7  ;;  %v445_v47 = vrot.slane %v1734_v41, 7  ;;  %v447_v48 = vrot.slane %v1730_v40, 7 }
  0xe5   :  { %v456_v50 = vrot.slane %v1732_v27, 1  ;;  %v457_v51 = vrot.slane %v1734_v41, 1  ;;  %v458_v52 = vrot.slane %v1736_v43, 1  ;;  %v446_v9 = vrot.slane %v1736_v43, 7 }
  0xe6   :  { %526 = vmatmul.bf16.vlgmr.msrb.gmra.mxu0 %v392_v45  ;;  %v451_v53 = vsel %vm224_vm3, %v447_v48, %v444_v46  ;;  %v450_v59 = vsel %vm224_vm3, %v444_v46, %v445_v47  ;;  %v459_v10 = vrot.slane %v1730_v40, 1  ;;  %v393_v14 = vpack.c.bf16 %v1730_v40, %v1736_v43 }
  0xe7   :  { %v452_v54 = vmul.f32 %v1651_v22, %v451_v53  ;;  %v461_v56 = vsel %vm237_vm4, %v457_v51, %v458_v52  ;;  %v462_v62 = vsel %vm237_vm4, %v456_v50, %v457_v51  ;;  %v449_v12 = vsel %vm224_vm3, %v445_v47, %v446_v9 }
  0xe8   :  { %v465_v60 = vmul.f32 %v1653_v24, %v461_v56  ;;  %v463_v13 = vsel %vm237_vm4, %v459_v10, %v456_v50  ;;  %v454_v16 = vmul.f32 %v1675_v42, %v449_v12  ;;  %v448_v25 = vsel %vm224_vm3, %v446_v9, %v447_v48 }
  0xe9   :  { %v468_v61 = vpack.c.bf16 %v450_v59, %v452_v54  ;;  %v467_v20 = vmul.f32 %v1679_v44, %v463_v13  ;;  %v460_v28 = vsel %vm237_vm4, %v458_v52, %v459_v10  ;;  %v158_v35 = vadd.f32 %v157_v32, %v156_v29  ;;  %v1798_v29 = vld [vmem:[#allocation2 + $0x178] sm:$0xff] }
  0xea   :  { %v604_v0 = vpack.c.bf16 %v465_v60, %v462_v62  ;;  %v469_v26 = vpack.c.bf16 %v448_v25, %v454_v16  ;;  %v179_v6 = vadd.f32 %v178_v36, %v177_v33  ;;  %v1480_v16 = vld [vmem:[#allocation2 + $0x138] sm:$0xff]  ;;  %v1479_v25 = vld [vmem:[#allocation2 + $0x130] sm:$0xff]  ;;  %1000 = vmatpush.bf16.msra.mxu1 %v1798_v29 }
  0xeb   :  { %593 = vmatmul.bf16.vlgmr.msrb.gmra.mxu1 %v468_v61  ;;  %v605_v31 = vpack.c.bf16 %v467_v20, %v460_v28  ;;  %v159_v37 = vrot.slane %v158_v35, 1  ;;  %864 = vmatpush.bf16.msrb.mxu3 %v1480_v16  ;;  %v1472_v28 = vld [vmem:[#allocation2 + $0xf8] sm:$0xff]  ;;  %v1467_v16 = vld [vmem:[#allocation2 + $0xd0] sm:$0xff] }
  0xec   :  { %662 = vmatmul.bf16.vlgmr.msrb.gmra.mxu2 %v604_v0  ;;  %v180_v4 = vrot.slane %v179_v6, 1  ;;  %931 = vmatpush.bf16.msra.mxu0 %v1472_v28 }
  0xed   :  { %v160_v38 = vadd.f32 %v159_v37, %v158_v35  ;;  %1489 = vmatpush.bf16.msra.mxu2 %v1472_v28  ;;  %v1478_v37 = vld [vmem:[#allocation2 + $0x128] sm:$0xff] }
  0xee   :  { %v181_v7 = vadd.f32 %v180_v4, %v179_v6  ;;  %v1466_v28 = vld [vmem:[#allocation2 + $0xc8] sm:$0xff] }
  0xef   :  { %v168_v39 = vmul.f32 %v1713_v55, %v160_v38  ;;  %865 = vmatpush.bf16.msrb.mxu3 %v1479_v25 }
  0xf0   :  { %v182_v45 = vmul.f32 %v181_v7, %v1713_v55  ;;  %v1810_v7 = vld [vmem:[#allocation2 + $0x170] sm:$0xff] }
  0xf1   :  { %v183_v46 = vmul.f32 %v168_v39, %v168_v39  ;;  %v186_v47 = vsub.f32 %v1728_v34, %v168_v39  ;;  %v187_v48 = vsub.f32 %v1743_v49, %v168_v39  ;;  %v188_v50 = vsub.f32 %v147_v3, %v168_v39  ;;  %1001 = vmatpush.bf16.msra.mxu1 %v1810_v7 }
  0xf2   :  { %v189_v60 = vsub.f32 %v149_v15, %v168_v39  ;;  %v1471_v39 = vld [vmem:[#allocation2 + $0xf0] sm:$0xff] }
  0xf3   :  { %v184_v51 = vsub.f32 %v182_v45, %v183_v46  ;;  %866 = vmatpush.bf16.msrb.mxu3 %v1478_v37  ;;  %932 = vmatpush.bf16.msra.mxu0 %v1471_v39 }
  0xf4   :  { %1490 = vmatpush.bf16.msra.mxu2 %v1471_v39 }
  0xf5   :  { %v185_v52 = vmax.f32 %v184_v51, 0.0 }
  0xf6   :  { %531 = vmatmul.bf16.gmra.mxu0 %v393_v14 }
  0xf7   :  { %v190_v53 = vadd.f32 1e-05, %v185_v52  ;;  %v1470_v52 = vld [vmem:[#allocation2 + $0xe8] sm:$0xff] }
  0xf8   :  { %933 = vmatpush.bf16.msra.mxu0 %v1470_v52  ;;  %1491 = vmatpush.bf16.msra.mxu2 %v1470_v52  ;;  %v728_v52 = vperm.slane %v1720_v17, 3 }
  0xf9   :  { %1517 = vrsqrt.f32 %v190_v53  ;;  %vm197_vm12 = vweird.f32 %v190_v53 }
  0xfb   :  { %598 = vmatmul.bf16.gmra.mxu1 %v469_v26 }
  0xfc   :  { %667 = vmatmul.bf16.gmra.mxu2 %v605_v31 }
  0xff   :  { %v1518_v54 = vpop.eup %1517 }
 0x100   :  { %v192_v56 = vmul.f32 %v1518_v54, %v190_v53  ;;  %vm198_vm13 = vweird.f32 %v1518_v54  ;;  %v1486_v53 = vld [vmem:[#allocation2 + $0x168] sm:$0xff] }
 0x101   :  { %vm199_vm14 = vmor %vm197_vm12, %vm198_vm13  ;;  %1002 = vmatpush.bf16.msra.mxu1 %v1486_v53 }
 0x102   :  { %v193_v57 = vmul.f32 %v1518_v54, %v192_v56 }
 0x104   :  { %v194_v58 = vmul.f32 0.5, %v193_v57  ;;  %v1476_v57 = vld [vmem:[#allocation2 + $0x118] sm:$0xff] }
 0x106   :  { %v195_v59 = vsub.f32 1.5, %v194_v58 }
 0x108   :  { %v196_v61 = vmul.f32 %v1518_v54, %v195_v59 }
 0x10a   :  { %v200_v62 = vsel %vm199_vm14, %v1518_v54, %v196_v61  ;;  %v1485_v61 = vld [vmem:[#allocation2 + $0x160] sm:$0xff] }
 0x10b   :  { %v1782_v63 = vmul.f32 %v200_v62, %v186_v47  ;;  %v1784_v34 = vmul.f32 %v200_v62, %v187_v48  ;;  %v1786_v49 = vmul.f32 %v200_v62, %v188_v50  ;;  %v1788_v0 = vmul.f32 %v200_v62, %v189_v60  ;;  %v1477_v48 = vld [vmem:[#allocation2 + $0x120] sm:$0xff]  ;;  %1003 = vmatpush.bf16.msra.mxu1 %v1485_v61 }
 0x10c   :  { %867 = vmatpush.bf16.msrb.mxu3 %v1477_v48  ;;  %v1469_v60 = vld [vmem:[#allocation2 + $0xe0] sm:$0xff] }
 0x10d   :  { %934 = vmatpush.bf16.msra.mxu0 %v1469_v60  ;;  %1492 = vmatpush.bf16.msra.mxu2 %v1469_v60 }
 0x110   :  { %868 = vmatpush.bf16.msrb.mxu3 %v1476_v57 }
 0x163   :  { %v527_v2 = vpop.f32.mrf.mxu0 }
 0x168   :  { %v594_v3 = vpop.f32.mrf.mxu1 }
 0x169   :  { %v595_v14 = vadd.f32 %v594_v3, %v527_v2  ;;  %v1475_v3 = vld [vmem:[#allocation2 + $0x110] sm:$0xff] }
 0x16a   :  { %869 = vmatpush.bf16.msrb.mxu3 %v1475_v3 }
 0x16b   :  { %v529_v9 = vpop.f32.mrf.mxu0 }
 0x16f   :  { %v663_v5 = vpop.f32.mrf.mxu2 }
 0x170   :  { %v596_v8 = vpop.f32.mrf.mxu1  ;;  %v1792_v20 = vadd.f32 %v663_v5, %v595_v14 }
 0x171   :  { %v597_v13 = vadd.f32 %v596_v8, %v529_v9  ;;  %v1468_v9 = vld [vmem:[#allocation2 + $0xd8] sm:$0xff] }
 0x172   :  { %v687_v30 = vmul.f32 %v1792_v20, %v1792_v20  ;;  %935 = vmatpush.bf16.msra.mxu0 %v1468_v9  ;;  %1493 = vmatpush.bf16.msra.mxu2 %v1468_v9 }
 0x173   :  { %v532_v12 = vpop.f32.mrf.mxu0 }
 0x176   :  { %936 = vmatpush.bf16.msra.mxu0 %v1467_v16  ;;  %1494 = vmatpush.bf16.msra.mxu2 %v1467_v16 }
 0x177   :  { %v665_v10 = vpop.f32.mrf.mxu2 }
 0x178   :  { %v599_v11 = vpop.f32.mrf.mxu1  ;;  %v1790_v18 = vadd.f32 %v665_v10, %v597_v13  ;;  %v1484_v10 = vld [vmem:[#allocation2 + $0x158] sm:$0xff]  ;;  %v1474_v13 = vld [vmem:[#allocation2 + $0x108] sm:$0xff] }
 0x179   :  { %v600_v19 = vadd.f32 %v599_v11, %v532_v12  ;;  %1004 = vmatpush.bf16.msra.mxu1 %v1484_v10  ;;  %870 = vmatpush.bf16.msrb.mxu3 %v1474_v13 }
 0x17a   :  { %v688_v26 = vmul.f32 %v1790_v18, %v1790_v18  ;;  %v677_v32 = vadd.f32 %v1790_v18, %v1792_v20  ;;  %937 = vmatpush.bf16.msra.mxu0 %v1466_v28  ;;  %1495 = vmatpush.bf16.msra.mxu2 %v1466_v28 }
 0x17b   :  { %v534_v31 = vpop.f32.mrf.mxu0 }
 0x17c   :  { %v691_v6 = vadd.f32 %v688_v26, %v687_v30  ;;  %v1473_v26 = vld [vmem:[#allocation2 + $0x100] sm:$0xff]  ;;  %v1482_v30 = vld [vmem:[#allocation2 + $0x148] sm:$0xff] }
 0x17d   :  { %871 = vmatpush.bf16.msrb.mxu3 %v1473_v26 }
 0x17f   :  { %v668_v15 = vpop.f32.mrf.mxu2 }
 0x180   :  { %v1794_v21 = vadd.f32 %v668_v15, %v600_v19  ;;  %v601_v23 = vpop.f32.mrf.mxu1  ;;  %v1483_v19 = vld [vmem:[#allocation2 + $0x150] sm:$0xff] }
 0x181   :  { %v602_v35 = vadd.f32 %v601_v23, %v534_v31  ;;  %1005 = vmatpush.bf16.msra.mxu1 %v1483_v19  ;;  %1497 = vmatpush.bf16.msra.mxu3 %v1798_v29 }
 0x182   :  { %v689_v33 = vmul.f32 %v1794_v21, %v1794_v21  ;;  %v678_v38 = vadd.f32 %v677_v32, %v1794_v21 }
 0x184   :  { %v692_v45 = vadd.f32 %v691_v6, %v689_v33  ;;  %v1465_v33 = vld [vmem:[#allocation2 + $0xc0] sm:$0xff] }
 0x185   :  { %1006 = vmatpush.bf16.msra.mxu1 %v1482_v30  ;;  %938 = vmatpush.bf16.msra.mxu0 %v1465_v33 }
 0x186   :  { %1498 = vmatpush.bf16.msra.mxu3 %v1810_v7  ;;  %1496 = vmatpush.bf16.msra.mxu2 %v1465_v33 }
 0x187   :  { %v670_v36 = vpop.f32.mrf.mxu2 }
 0x188   :  { %v1808_v4 = vadd.f32 %v670_v36, %v602_v35  ;;  %v1481_v35 = vld [vmem:[#allocation2 + $0x140] sm:$0xff] }
 0x189   :  { %1007 = vmatpush.bf16.msra.mxu1 %v1481_v35 }
 0x18a   :  { %v679_v46 = vadd.f32 %v678_v38, %v1808_v4  ;;  %v690_v47 = vmul.f32 %v1808_v4, %v1808_v4  ;;  %1499 = vmatpush.bf16.msra.mxu3 %v1486_v53 }
 0x18c   :  { %v680_v50 = vrot.slane %v679_v46, 4  ;;  %v693_v51 = vadd.f32 %v692_v45, %v690_v47 }
 0x18e   :  { %v681_v54 = vadd.f32 %v680_v50, %v679_v46  ;;  %v694_v56 = vrot.slane %v693_v51, 4  ;;  %1500 = vmatpush.bf16.msra.mxu3 %v1485_v61  ;;  %v723_v46 = vperm.slane %v1720_v17, 2 }
 0x190   :  { %v682_v58 = vrot.slane %v681_v54, 2  ;;  %v695_v59 = vadd.f32 %v694_v56, %v693_v51 }
 0x192   :  { %v683_v62 = vadd.f32 %v682_v58, %v681_v54  ;;  %v696_v2 = vrot.slane %v695_v59, 2  ;;  %1501 = vmatpush.bf16.msra.mxu3 %v1484_v10 }
 0x194   :  { %v684_v5 = vrot.slane %v683_v62, 1  ;;  %v697_v8 = vadd.f32 %v696_v2, %v695_v59 }
 0x196   :  { %v685_v11 = vadd.f32 %v684_v5, %v683_v62  ;;  %v698_v12 = vrot.slane %v697_v8, 1  ;;  %1502 = vmatpush.bf16.msra.mxu3 %v1483_v19 }
 0x198   :  { %v686_v14 = vmul.f32 %v685_v11, %v1713_v55  ;;  %v699_v15 = vadd.f32 %v698_v12, %v697_v8 }
 0x19a   :  { %v700_v23 = vmul.f32 %v699_v15, %v1713_v55  ;;  %v701_v25 = vmul.f32 %v686_v14, %v686_v14  ;;  %v704_v47 = vsub.f32 %v1792_v20, %v686_v14  ;;  %v705_v48 = vsub.f32 %v1790_v18, %v686_v14  ;;  %1503 = vmatpush.bf16.msra.mxu3 %v1482_v30 }
 0x19b   :  { %v706_v7 = vsub.f32 %v1794_v21, %v686_v14  ;;  %v707_v50 = vsub.f32 %v1808_v4, %v686_v14 }
 0x19c   :  { %v702_v31 = vsub.f32 %v700_v23, %v701_v25 }
 0x19e   :  { %v703_v32 = vmax.f32 %v702_v31, 0.0  ;;  %1504 = vmatpush.bf16.msra.mxu3 %v1481_v35 }
 0x1a0   :  { %v708_v36 = vadd.f32 1e-05, %v703_v32 }
 0x1a2   :  { %1519 = vrsqrt.f32 %v708_v36  ;;  %vm715_vm0 = vweird.f32 %v708_v36 }
 0x1a8   :  { %v1520_v37 = vpop.eup %1519 }
 0x1a9   :  { %v710_v6 = vmul.f32 %v1520_v37, %v708_v36  ;;  %vm716_vm15 = vweird.f32 %v1520_v37 }
 0x1aa   :  { %vm717_vm1 = vmor %vm715_vm0, %vm716_vm15 }
 0x1ab   :  { %v711_v38 = vmul.f32 %v1520_v37, %v710_v6 }
 0x1ad   :  { %v712_v39 = vmul.f32 0.5, %v711_v38 }
 0x1af   :  { %v713_v45 = vsub.f32 1.5, %v712_v39 }
 0x1b1   :  { %v714_v29 = vmul.f32 %v1520_v37, %v713_v45 }
 0x1b3   :  { %v718_v51 = vsel %vm717_vm1, %v1520_v37, %v714_v29 }
 0x1b4   :  { %v719_v53 = vmul.f32 %v718_v51, %v704_v47  ;;  %v720_v54 = vmul.f32 %v718_v51, %v705_v48  ;;  %v721_v56 = vmul.f32 %v718_v51, %v706_v7  ;;  %v722_v57 = vmul.f32 %v718_v51, %v707_v50 }
 0x1b6   :  { %v726_v58 = vmul.f32 %v723_v46, %v721_v56  ;;  %v727_v59 = vmul.f32 %v723_v46, %v722_v57  ;;  %v724_v60 = vmul.f32 %v723_v46, %v719_v53  ;;  %v725_v61 = vmul.f32 %v723_v46, %v720_v54 }
 0x1b8   :  { %v731_v20 = vadd.f32 %v728_v52, %v726_v58  ;;  %v732_v18 = vadd.f32 %v728_v52, %v727_v59  ;;  %v729_v62 = vadd.f32 %v728_v52, %v724_v60  ;;  %v730_v21 = vadd.f32 %v728_v52, %v725_v61 }
 0x1ba   :  { %v1826_v2 = vmax.f32 %v731_v20, 0.0  ;;  %v1828_v4 = vmax.f32 %v732_v18, 0.0  ;;  %v1830_v3 = vmax.f32 %v729_v62, 0.0  ;;  %v1832_v5 = vmax.f32 %v730_v21, 0.0 }
 0x1bc   :  { %v737_v8 = vpack.c.bf16 %v1832_v5, %v1830_v3  ;;  %v790_v9 = vrot.slane %v1830_v3, 7  ;;  %v791_v10 = vrot.slane %v1832_v5, 7  ;;  %v793_v11 = vrot.slane %v1828_v4, 7 }
 0x1bd   :  { %v792_v12 = vrot.slane %v1826_v2, 7  ;;  %v802_v13 = vrot.slane %v1830_v3, 1  ;;  %v803_v14 = vrot.slane %v1832_v5, 1  ;;  %v804_v15 = vrot.slane %v1826_v2, 1 }
 0x1be   :  { %872 = vmatmul.bf16.vlgmr.msrb.gmra.mxu3 %v737_v8  ;;  %v797_v16 = vsel %vm224_vm3, %v793_v11, %v790_v9  ;;  %v796_v28 = vsel %vm224_vm3, %v790_v9, %v791_v10 }
 0x1bf   :  { %v795_v19 = vsel %vm224_vm3, %v791_v10, %v792_v12  ;;  %v798_v23 = vmul.f32 %v1651_v22, %v797_v16  ;;  %v807_v26 = vsel %vm237_vm4, %v803_v14, %v804_v15  ;;  %v794_v30 = vsel %vm224_vm3, %v792_v12, %v793_v11 }
 0x1c0   :  { %v800_v25 = vmul.f32 %v1675_v42, %v795_v19  ;;  %v811_v31 = vmul.f32 %v1653_v24, %v807_v26  ;;  %v808_v35 = vsel %vm237_vm4, %v802_v13, %v803_v14  ;;  %v738_v22 = vpack.c.bf16 %v1828_v4, %v1826_v2 }
 0x1c1   :  { %v814_v32 = vpack.c.bf16 %v796_v28, %v798_v23  ;;  %v805_v42 = vrot.slane %v1828_v4, 1 }
 0x1c2   :  { %v815_v33 = vpack.c.bf16 %v794_v30, %v800_v25  ;;  %v950_v36 = vpack.c.bf16 %v811_v31, %v808_v35 }
 0x1c3   :  { %939 = vmatmul.bf16.vlgmr.msra.gmra.mxu0 %v814_v32  ;;  %v809_v37 = vsel %vm237_vm4, %v805_v42, %v802_v13  ;;  %v806_v6 = vsel %vm237_vm4, %v804_v15, %v805_v42 }
 0x1c4   :  { %944 = vmatmul.bf16.vlgmr.msra.gmra.mxu2 %v815_v33  ;;  %1008 = vmatmul.bf16.vlgmr.msra.gmra.mxu1 %v950_v36  ;;  %v813_v24 = vmul.f32 %v1679_v44, %v809_v37 }
 0x1c6   :  { %v951_v38 = vpack.c.bf16 %v813_v24, %v806_v6 }
 0x1ce   :  { %877 = vmatmul.bf16.gmra.mxu3 %v738_v22 }
 0x1de   :  { %1013 = vmatmul.bf16.vlgmr.msra.gmra.mxu3 %v951_v38 }
 0x240   :  { %v940_v29 = vpop.f32.mrf.mxu0 }
 0x241   :  { %v873_v39 = vpop.f32.mrf.mxu3  ;;  %v1009_v47 = vpop.f32.mrf.mxu1 }
 0x242   :  { %v941_v52 = vadd.f32 %v940_v29, %v873_v39 }
 0x244   :  { %v1019_v44 = vadd.f32 %v1009_v47, %v941_v52  ;;  %v1069_v47 = vperm.slane %v1720_v17, 4 }
 0x246   :  { %v1033_v60 = vmul.f32 %v1019_v44, %v1019_v44 }
 0x247   :  { %v945_v50 = vpop.f32.mrf.mxu2 }
 0x248   :  { %v942_v7 = vpop.f32.mrf.mxu0 }
 0x249   :  { %v875_v45 = vpop.f32.mrf.mxu3  ;;  %v1011_v53 = vpop.f32.mrf.mxu1 }
 0x24a   :  { %v943_v51 = vadd.f32 %v942_v7, %v875_v45 }
 0x24c   :  { %v1020_v56 = vadd.f32 %v1011_v53, %v943_v51  ;;  %v1074_v53 = vperm.slane %v1720_v17, 5 }
 0x24e   :  { %v1034_v1 = vmul.f32 %v1020_v56, %v1020_v56  ;;  %v1023_v20 = vadd.f32 %v1020_v56, %v1019_v44 }
 0x24f   :  { %v947_v59 = vpop.f32.mrf.mxu2 }
 0x250   :  { %v1037_v8 = vadd.f32 %v1034_v1, %v1033_v60 }
 0x251   :  { %v878_v46 = vpop.f32.mrf.mxu3 }
 0x252   :  { %v946_v57 = vadd.f32 %v945_v50, %v878_v46 }
 0x259   :  { %v880_v48 = vpop.f32.mrf.mxu3 }
 0x25a   :  { %v948_v61 = vadd.f32 %v947_v59, %v880_v48 }
 0x261   :  { %v1014_v54 = vpop.f32.mrf.mxu3 }
 0x262   :  { %v1021_v58 = vadd.f32 %v1014_v54, %v946_v57 }
 0x264   :  { %v1035_v18 = vmul.f32 %v1021_v58, %v1021_v58  ;;  %v1024_v21 = vadd.f32 %v1023_v20, %v1021_v58 }
 0x266   :  { %v1038_v10 = vadd.f32 %v1037_v8, %v1035_v18 }
 0x269   :  { %v1016_v62 = vpop.f32.mrf.mxu3 }
 0x26a   :  { %v1022_v9 = vadd.f32 %v1016_v62, %v948_v61 }
 0x26c   :  { %v1025_v11 = vadd.f32 %v1024_v21, %v1022_v9  ;;  %v1036_v12 = vmul.f32 %v1022_v9, %v1022_v9 }
 0x26e   :  { %v1026_v13 = vrot.slane %v1025_v11, 4  ;;  %v1039_v14 = vadd.f32 %v1038_v10, %v1036_v12 }
 0x270   :  { %v1027_v15 = vadd.f32 %v1026_v13, %v1025_v11  ;;  %v1040_v16 = vrot.slane %v1039_v14, 4 }
 0x272   :  { %v1028_v19 = vrot.slane %v1027_v15, 2  ;;  %v1041_v23 = vadd.f32 %v1040_v16, %v1039_v14  ;;  %v1086_v14 = vadd.f32 %v1828_v4, %v1730_v40 }
 0x274   :  { %v1029_v25 = vadd.f32 %v1028_v19, %v1027_v15  ;;  %v1042_v26 = vrot.slane %v1041_v23, 2 }
 0x276   :  { %v1030_v28 = vrot.slane %v1029_v25, 1  ;;  %v1043_v30 = vadd.f32 %v1042_v26, %v1041_v23 }
 0x278   :  { %v1031_v31 = vadd.f32 %v1030_v28, %v1029_v25  ;;  %v1044_v32 = vrot.slane %v1043_v30, 1 }
 0x27a   :  { %v1032_v33 = vmul.f32 %v1031_v31, %v1713_v55  ;;  %v1045_v35 = vadd.f32 %v1044_v32, %v1043_v30 }
 0x27c   :  { %v1046_v36 = vmul.f32 %v1045_v35, %v1713_v55  ;;  %v1047_v22 = vmul.f32 %v1032_v33, %v1032_v33  ;;  %v1050_v48 = vsub.f32 %v1019_v44, %v1032_v33  ;;  %v1051_v7 = vsub.f32 %v1020_v56, %v1032_v33 }
 0x27d   :  { %v1052_v50 = vsub.f32 %v1021_v58, %v1032_v33  ;;  %v1053_v51 = vsub.f32 %v1022_v9, %v1032_v33  ;;  %v1083_v56 = vadd.f32 %v1830_v3, %v1732_v27  ;;  %v1084_v44 = vadd.f32 %v1832_v5, %v1734_v41 }
 0x27e   :  { %v1048_v42 = vsub.f32 %v1046_v36, %v1047_v22  ;;  %v1085_v58 = vadd.f32 %v1826_v2, %v1736_v43 }
 0x280   :  { %v1049_v37 = vmax.f32 %v1048_v42, 0.0 }
 0x282   :  { %v1054_v24 = vadd.f32 1e-05, %v1049_v37 }
 0x284   :  { %1521 = vrsqrt.f32 %v1054_v24  ;;  %vm1061_vm3 = vweird.f32 %v1054_v24 }
 0x28a   :  { %v1522_v6 = vpop.eup %1521 }
 0x28b   :  { %v1056_v38 = vmul.f32 %v1522_v6, %v1054_v24  ;;  %vm1062_vm2 = vweird.f32 %v1522_v6 }
 0x28c   :  { %vm1063_vm4 = vmor %vm1061_vm3, %vm1062_vm2 }
 0x28d   :  { %v1057_v39 = vmul.f32 %v1522_v6, %v1056_v38 }
 0x28f   :  { %v1058_v45 = vmul.f32 0.5, %v1057_v39 }
 0x291   :  { %v1059_v29 = vsub.f32 1.5, %v1058_v45 }
 0x293   :  { %v1060_v46 = vmul.f32 %v1522_v6, %v1059_v29 }
 0x295   :  { %v1064_v52 = vsel %vm1063_vm4, %v1522_v6, %v1060_v46 }
 0x296   :  { %v1065_v54 = vmul.f32 %v1064_v52, %v1050_v48  ;;  %v1066_v57 = vmul.f32 %v1064_v52, %v1051_v7  ;;  %v1067_v1 = vmul.f32 %v1064_v52, %v1052_v50  ;;  %v1068_v59 = vmul.f32 %v1064_v52, %v1053_v51 }
 0x298   :  { %v1070_v60 = vmul.f32 %v1069_v47, %v1065_v54  ;;  %v1071_v61 = vmul.f32 %v1069_v47, %v1066_v57  ;;  %v1072_v20 = vmul.f32 %v1069_v47, %v1067_v1  ;;  %v1073_v18 = vmul.f32 %v1069_v47, %v1068_v59  ;;  %v1884_v59 = vld [vmem:[%s1903_s3 + $0x8] sm:$0xf]  ;;  %s1584_s3 = smov [#allocation5]  }
 0x299   :  { %v205_v1 = vperm.slane %v1720_v17, 6  ;;  %s1219_s13 = sshll.u32 %s1584_s3, 4  ;;  %s1220_s13 = int_to_ptr.vmem [resolvable:$true] %s1219_s13 }
 0x29a   :  { %v1075_v62 = vadd.f32 %v1074_v53, %v1070_v60  ;;  %v1076_v21 = vadd.f32 %v1074_v53, %v1071_v61  ;;  %v1077_v8 = vadd.f32 %v1074_v53, %v1072_v20  ;;  %v1078_v10 = vadd.f32 %v1074_v53, %v1073_v18 }
 0x29b   :  { %v206_v20 = vmul.f32 %v205_v1, %v1782_v63  ;;  %v207_v18 = vmul.f32 %v205_v1, %v1784_v34 }
 0x29c   :  { %v1079_v9 = vmax.f32 %v1075_v62, 0.0  ;;  %v1080_v11 = vmax.f32 %v1076_v21, 0.0  ;;  %v1081_v12 = vmax.f32 %v1077_v8, 0.0  ;;  %v1082_v13 = vmax.f32 %v1078_v10, 0.0 }
 0x29d   :  { %v210_v62 = vperm.slane %v1720_v17, 7  ;;  %v1137_v21 = vperm.slane %v1884_v59, 0  ;;  %v208_v8 = vmul.f32 %v205_v1, %v1786_v49  ;;  %v209_v10 = vmul.f32 %v205_v1, %v1788_v0 }
 0x29e   :  { %v1087_v15 = vadd.f32 %v1083_v56, %v1079_v9  ;;  %v1088_v16 = vadd.f32 %v1084_v44, %v1080_v11  ;;  %v1089_v19 = vadd.f32 %v1085_v58, %v1081_v12  ;;  %v1090_v23 = vadd.f32 %v1086_v14, %v1082_v13 }
 0x29f   :  { %v1142_v44 = vperm.slane %v1884_v59, 1  ;;  %v212_v17 = vadd.f32 %v210_v62, %v207_v18 }
 0x2a0   :  { %v1091_v25 = vadd.f32 %v1088_v16, %v1087_v15  ;;  %v1101_v26 = vmul.f32 %v1087_v15, %v1087_v15  ;;  %v1102_v27 = vmul.f32 %v1088_v16, %v1088_v16  ;;  %v1103_v28 = vmul.f32 %v1089_v19, %v1089_v19 }
 0x2a1   :  { %v1104_v30 = vmul.f32 %v1090_v23, %v1090_v23 }
 0x2a2   :  { %v1092_v3 = vadd.f32 %v1091_v25, %v1089_v19  ;;  %v1105_v41 = vadd.f32 %v1102_v27, %v1101_v26 }
 0x2a4   :  { %v1093_v5 = vadd.f32 %v1092_v3, %v1090_v23  ;;  %v1106_v43 = vadd.f32 %v1105_v41, %v1103_v28 }
 0x2a6   :  { %v1094_v2 = vrot.slane %v1093_v5, 4  ;;  %v1107_v31 = vadd.f32 %v1106_v43, %v1104_v30 }
 0x2a8   :  { %v1095_v32 = vadd.f32 %v1094_v2, %v1093_v5  ;;  %v1108_v33 = vrot.slane %v1107_v31, 4 }
 0x2aa   :  { %v1096_v35 = vrot.slane %v1095_v32, 2  ;;  %v1109_v36 = vadd.f32 %v1108_v33, %v1107_v31 }
 0x2ac   :  { %v1097_v40 = vadd.f32 %v1096_v35, %v1095_v32  ;;  %v1110_v4 = vrot.slane %v1109_v36, 2 }
 0x2ae   :  { %v1098_v22 = vrot.slane %v1097_v40, 1  ;;  %v1111_v42 = vadd.f32 %v1110_v4, %v1109_v36 }
 0x2b0   :  { %v1099_v37 = vadd.f32 %v1098_v22, %v1097_v40  ;;  %v1112_v24 = vrot.slane %v1111_v42, 1 }
 0x2b2   :  { %v1100_v6 = vmul.f32 %v1099_v37, %v1713_v55  ;;  %v1113_v38 = vadd.f32 %v1112_v24, %v1111_v42 }
 0x2b4   :  { %v1114_v39 = vmul.f32 %v1113_v38, %v1713_v55  ;;  %v1115_v45 = vmul.f32 %v1100_v6, %v1100_v6  ;;  %v1118_v29 = vsub.f32 %v1087_v15, %v1100_v6  ;;  %v1119_v46 = vsub.f32 %v1088_v16, %v1100_v6 }
 0x2b5   :  { %v1120_v47 = vsub.f32 %v1089_v19, %v1100_v6  ;;  %v1121_v48 = vsub.f32 %v1090_v23, %v1100_v6  ;;  %v211_v15 = vadd.f32 %v210_v62, %v206_v20  ;;  %v213_v16 = vadd.f32 %v210_v62, %v208_v8 }
 0x2b6   :  { %v1116_v7 = vsub.f32 %v1114_v39, %v1115_v45  ;;  %v214_v19 = vadd.f32 %v210_v62, %v209_v10 }
 0x2b8   :  { %v1117_v50 = vmax.f32 %v1116_v7, 0.0 }
 0x2ba   :  { %v1122_v51 = vadd.f32 1e-05, %v1117_v50 }
 0x2bc   :  { %1523 = vrsqrt.f32 %v1122_v51  ;;  %vm1129_vm6 = vweird.f32 %v1122_v51 }
 0x2c2   :  { %v1524_v52 = vpop.eup %1523 }
 0x2c3   :  { %v1124_v53 = vmul.f32 %v1524_v52, %v1122_v51  ;;  %vm1130_vm5 = vweird.f32 %v1524_v52 }
 0x2c4   :  { %vm1131_vm7 = vmor %vm1129_vm6, %vm1130_vm5 }
 0x2c5   :  { %v1125_v54 = vmul.f32 %v1524_v52, %v1124_v53 }
 0x2c7   :  { %v1126_v57 = vmul.f32 0.5, %v1125_v54 }
 0x2c9   :  { %v1127_v60 = vsub.f32 1.5, %v1126_v57 }
 0x2cb   :  { %v1128_v61 = vmul.f32 %v1524_v52, %v1127_v60 }
 0x2cd   :  { %v1132_v56 = vsel %vm1131_vm7, %v1524_v52, %v1128_v61 }
 0x2ce   :  { %v1133_v58 = vmul.f32 %v1132_v56, %v1118_v29  ;;  %v1134_v9 = vmul.f32 %v1132_v56, %v1119_v46  ;;  %v1135_v11 = vmul.f32 %v1132_v56, %v1120_v47  ;;  %v1136_v12 = vmul.f32 %v1132_v56, %v1121_v48 }
 0x2d0   :  { %v1138_v13 = vmul.f32 %v1137_v21, %v1133_v58  ;;  %v1139_v63 = vmul.f32 %v1137_v21, %v1134_v9  ;;  %v1140_v14 = vmul.f32 %v1137_v21, %v1135_v11  ;;  %v1141_v34 = vmul.f32 %v1137_v21, %v1136_v12 }
 0x2d1   :  { %v1206_v9 = vperm.slane %v1884_v59, 3 }
 0x2d2   :  { %v1143_v23 = vadd.f32 %v1142_v44, %v1138_v13  ;;  %v1144_v25 = vadd.f32 %v1142_v44, %v1139_v63  ;;  %v1145_v49 = vadd.f32 %v1142_v44, %v1140_v14  ;;  %v1146_v26 = vadd.f32 %v1142_v44, %v1141_v34 }
 0x2d4   :  { %v1147_v0 = vadd.f32 %v1143_v23, %v211_v15  ;;  %v1148_v27 = vadd.f32 %v1144_v25, %v212_v17  ;;  %v1149_v3 = vadd.f32 %v1145_v49, %v213_v16  ;;  %v1150_v28 = vadd.f32 %v1146_v26, %v214_v19 }
 0x2d6   :  { %v1151_v41 = vmax.f32 %v1147_v0, 0.0  ;;  %v1152_v5 = vmax.f32 %v1148_v27, 0.0  ;;  %v1153_v30 = vmax.f32 %v1149_v3, 0.0  ;;  %v1154_v43 = vmax.f32 %v1150_v28, 0.0 }
 0x2d8   :  { %v1155_v2 = vadd.f32 %v1152_v5, %v1151_v41  ;;  %v1165_v31 = vmul.f32 %v1151_v41, %v1151_v41  ;;  %v1166_v32 = vmul.f32 %v1152_v5, %v1152_v5  ;;  %v1167_v35 = vmul.f32 %v1153_v30, %v1153_v30 }
 0x2d9   :  { %v1168_v4 = vmul.f32 %v1154_v43, %v1154_v43 }
 0x2da   :  { %v1156_v33 = vadd.f32 %v1155_v2, %v1153_v30  ;;  %v1169_v36 = vadd.f32 %v1166_v32, %v1165_v31 }
 0x2dc   :  { %v1157_v40 = vadd.f32 %v1156_v33, %v1154_v43  ;;  %v1170_v22 = vadd.f32 %v1169_v36, %v1167_v35 }
 0x2de   :  { %v1158_v42 = vrot.slane %v1157_v40, 4  ;;  %v1171_v37 = vadd.f32 %v1170_v22, %v1168_v4 }
 0x2e0   :  { %v1159_v24 = vadd.f32 %v1158_v42, %v1157_v40  ;;  %v1172_v6 = vrot.slane %v1171_v37, 4 }
 0x2e2   :  { %v1160_v38 = vrot.slane %v1159_v24, 2  ;;  %v1173_v39 = vadd.f32 %v1172_v6, %v1171_v37 }
 0x2e4   :  { %v1161_v45 = vadd.f32 %v1160_v38, %v1159_v24  ;;  %v1174_v29 = vrot.slane %v1173_v39, 2 }
 0x2e6   :  { %v1162_v46 = vrot.slane %v1161_v45, 1  ;;  %v1175_v47 = vadd.f32 %v1174_v29, %v1173_v39 }
 0x2e8   :  { %v1163_v48 = vadd.f32 %v1162_v46, %v1161_v45  ;;  %v1176_v7 = vrot.slane %v1175_v47, 1 }
 0x2ea   :  { %v1164_v50 = vmul.f32 %v1163_v48, %v1713_v55  ;;  %v1177_v51 = vadd.f32 %v1176_v7, %v1175_v47 }
 0x2ec   :  { %v1178_v52 = vmul.f32 %v1177_v51, %v1713_v55  ;;  %v1179_v53 = vmul.f32 %v1164_v50, %v1164_v50  ;;  %v1182_v54 = vsub.f32 %v1151_v41, %v1164_v50  ;;  %v1183_v57 = vsub.f32 %v1152_v5, %v1164_v50 }
 0x2ed   :  { %v1184_v1 = vsub.f32 %v1153_v30, %v1164_v50  ;;  %v1185_v60 = vsub.f32 %v1154_v43, %v1164_v50  ;;  %v1201_v55 = vperm.slane %v1884_v59, 2 }
 0x2ee   :  { %v1180_v61 = vsub.f32 %v1178_v52, %v1179_v53 }
 0x2f0   :  { %v1181_v20 = vmax.f32 %v1180_v61, 0.0 }
 0x2f2   :  { %v1186_v18 = vadd.f32 1e-05, %v1181_v20 }
 0x2f4   :  { %1525 = vrsqrt.f32 %v1186_v18  ;;  %vm1193_vm9 = vweird.f32 %v1186_v18 }
 0x2fa   :  { %v1526_v62 = vpop.eup %1525 }
 0x2fb   :  { %v1188_v21 = vmul.f32 %v1526_v62, %v1186_v18  ;;  %vm1194_vm8 = vweird.f32 %v1526_v62 }
 0x2fc   :  { %vm1195_vm10 = vmor %vm1193_vm9, %vm1194_vm8 }
 0x2fd   :  { %v1189_v8 = vmul.f32 %v1526_v62, %v1188_v21 }
 0x2ff   :  { %v1190_v10 = vmul.f32 0.5, %v1189_v8 }
 0x301   :  { %v1191_v56 = vsub.f32 1.5, %v1190_v10 }
 0x303   :  { %v1192_v44 = vmul.f32 %v1526_v62, %v1191_v56 }
 0x305   :  { %v1196_v58 = vsel %vm1195_vm10, %v1526_v62, %v1192_v44 }
 0x306   :  { %v1197_v11 = vmul.f32 %v1196_v58, %v1182_v54  ;;  %v1198_v12 = vmul.f32 %v1196_v58, %v1183_v57  ;;  %v1199_v13 = vmul.f32 %v1196_v58, %v1184_v1  ;;  %v1200_v63 = vmul.f32 %v1196_v58, %v1185_v60 }
 0x308   :  { %v1202_v14 = vmul.f32 %v1201_v55, %v1197_v11  ;;  %v1203_v34 = vmul.f32 %v1201_v55, %v1198_v12  ;;  %v1204_v15 = vmul.f32 %v1201_v55, %v1199_v13  ;;  %v1205_v17 = vmul.f32 %v1201_v55, %v1200_v63 }
 0x30a   :  { %v1207_v16 = vadd.f32 %v1206_v9, %v1202_v14  ;;  %v1208_v19 = vadd.f32 %v1206_v9, %v1203_v34  ;;  %v1209_v23 = vadd.f32 %v1206_v9, %v1204_v15  ;;  %v1210_v25 = vadd.f32 %v1206_v9, %v1205_v17 }
 0x30c   :  { %1211 = vst [vmem:[#allocation5] sm:$0xff] %v1207_v16 }
 0x30d   :  { %1212 = vst [vmem:[#allocation5 + $0x8] sm:$0xff] %v1208_v19 }
 0x30e   :  { %1213 = vst [vmem:[#allocation5 + $0x10] sm:$0xff] %v1209_v23 }
 0x30f   :  { %1214 = vst [vmem:[#allocation5 + $0x18] sm:$0xff] %v1210_v25 }
 0x310   :  { %1227 = dma.vmem_to_hbm [thread:$0]  %s1220_s13, 512, %s1222_s16, [#allocation4], %s1585_s17, %s1585_s17, %s1586_s18  }
 0x311   :  { %1577 = dma.done.wait [#allocation4], 512  }
 0x312   :  { %1578 = vsyncadd [#allocation4], 4294966784 }
 0x313   :  { %1232 = vsyncpa [#allocation3], 1 }
 0x314   :  { %1233 = vsyncpa [#allocation4], 1 }

</bundles_post_ra>
